<compile_context>
chip_gen: v5e
topology: v5e:2x2
jax: 0.10.0
libtpu: 0.0.40
codegen_flags: <defaults>
</compile_context>

<pallas_src>
import functools

import jax
import jax.numpy as jnp
from jax import lax
from jax.experimental import pallas as pl
from jax.experimental.pallas import tpu as pltpu

BN_EPS = 1e-5


def _round_up(x, m):
    return (x + m - 1) // m * m


# --------------------------------------------------------------------------
# Fused GEMM + bias (+ residual) (+ ReLU) kernels for the 1x1 convolutions.
# Operands are bf16, accumulation / epilogue in f32.
# --------------------------------------------------------------------------
def _gemm_kernel(a_ref, w_ref, b_ref, o_ref, *, relu):
    acc = jnp.dot(a_ref[...], w_ref[...], preferred_element_type=jnp.float32)
    out = acc + b_ref[...]
    if relu:
        out = jnp.maximum(out, 0.0)
    o_ref[...] = out.astype(o_ref.dtype)


def _gemm_res_kernel(a_ref, w_ref, b_ref, r_ref, o_ref, *, relu):
    acc = jnp.dot(a_ref[...], w_ref[...], preferred_element_type=jnp.float32)
    out = acc + b_ref[...] + r_ref[...].astype(jnp.float32)
    if relu:
        out = jnp.maximum(out, 0.0)
    o_ref[...] = out.astype(o_ref.dtype)


def gemm_bias_act(a, w, bias, residual=None, relu=True, out_dtype=jnp.float32):
    """out = act(a @ w + bias [+ residual]); a:(M,K) bf16, w:(K,N) bf16 (BN
    scale already folded), bias:(N,) f32.  Full-K single block, grid over
    (M, N) tiles only (both 'parallel')."""
    M, K = a.shape
    _, N = w.shape

    # M tiling: full-dim block when small (no padding), else 512-row tiles.
    if M <= 512:
        TM, Mp = M, M
    else:
        TM = 512
        Mp = _round_up(M, TM)
    # N tiling: full-dim block when small, else MXU-width 256 (or 128) tiles.
    if N <= 512:
        TN = N
    elif N % 256 == 0:
        TN = 256
    elif N % 128 == 0:
        TN = 128
    else:
        TN = N

    a_p = a if Mp == M else jnp.pad(a, ((0, Mp - M), (0, 0)))
    bias2d = bias.reshape(1, N).astype(jnp.float32)

    in_specs = [
        pl.BlockSpec((TM, K), lambda i, j: (i, 0)),
        pl.BlockSpec((K, TN), lambda i, j: (0, j)),
        pl.BlockSpec((1, TN), lambda i, j: (0, j)),
    ]
    args = [a_p, w, bias2d]
    bytes_accessed = (a_p.size * a_p.dtype.itemsize + w.size * w.dtype.itemsize
                      + bias2d.size * 4 + Mp * N * jnp.dtype(out_dtype).itemsize)

    if residual is not None:
        r_p = residual if Mp == M else jnp.pad(residual, ((0, Mp - M), (0, 0)))
        in_specs.append(pl.BlockSpec((TM, TN), lambda i, j: (i, j)))
        args.append(r_p)
        bytes_accessed += r_p.size * r_p.dtype.itemsize
        kern = functools.partial(_gemm_res_kernel, relu=relu)
    else:
        kern = functools.partial(_gemm_kernel, relu=relu)

    out = pl.pallas_call(
        kern,
        out_shape=jax.ShapeDtypeStruct((Mp, N), out_dtype),
        grid_spec=pltpu.PrefetchScalarGridSpec(
            num_scalar_prefetch=0,
            grid=(Mp // TM, N // TN),
            in_specs=in_specs,
            out_specs=pl.BlockSpec((TM, TN), lambda i, j: (i, j)),
        ),
        compiler_params=pltpu.CompilerParams(
            dimension_semantics=("parallel", "parallel")),
        cost_estimate=pl.CostEstimate(
            flops=2 * Mp * N * K, transcendentals=0,
            bytes_accessed=int(bytes_accessed)),
    )(*args)
    return out if Mp == M else out[:M]


def _fold_bn(bn):
    scale = bn['g'] / jnp.sqrt(bn['v'] + BN_EPS)
    bias = bn['b'] - bn['m'] * scale
    return scale, bias.astype(jnp.float32)


def conv1x1_bn_act(x, w, bn, stride=1, relu=True, residual=None,
                   out_dtype=jnp.float32):
    """1x1 conv (no bias) + eval-mode BN (+ residual, + ReLU).
    x: NHWC, w: (Cout, Cin, 1, 1) (PyTorch layout)."""
    if stride > 1:
        x = x[:, ::stride, ::stride, :]
    B, H, W, Cin = x.shape
    Cout = w.shape[0]
    scale, bias = _fold_bn(bn)
    wmat = (w.reshape(Cout, Cin).T * scale[None, :]).astype(jnp.bfloat16)
    a = x.reshape(B * H * W, Cin).astype(jnp.bfloat16)
    res = None
    if residual is not None:
        res = residual.reshape(B * H * W, Cout).astype(jnp.float32)
    out = gemm_bias_act(a, wmat, bias, residual=res, relu=relu,
                        out_dtype=out_dtype)
    return out.reshape(B, H, W, Cout)


# --------------------------------------------------------------------------
# Fused 3x3 (stride=1, padding=dilation, dilation=d) conv + BN + ReLU.
# One grid step per batch image; the padded image lives in VMEM and each of
# the 9 taps is a statically row-shifted 2-D GEMM (no im2col in HBM).
# --------------------------------------------------------------------------
def _conv3x3_kernel(x_ref, w_ref, b_ref, o_ref, *, Wp, d, m_out, relu):
    # x_ref: (rows, Cin) bf16  -- whole padded image, row-major over (h, w)
    # w_ref: (9, Cin, Cout) bf16 (BN scale folded), b_ref: (1, Cout) f32
    # o_ref: (m_out, Cout)  -- row r = h*Wp + w (cols w >= W are junk, dropped)
    cout = o_ref.shape[-1]
    acc = jnp.zeros((m_out, cout), jnp.float32)
    for t in range(9):
        i, j = divmod(t, 3)
        off = i * d * Wp + j * d              # static row offset of tap (i, j)
        a_t = x_ref[off:off + m_out, :]
        acc = acc + jnp.dot(a_t, w_ref[t], preferred_element_type=jnp.float32)
    out = acc + b_ref[...]
    if relu:
        out = jnp.maximum(out, 0.0)
    o_ref[...] = out.astype(o_ref.dtype)


def conv3x3_bn_act(x, w, bn, dilation=1, relu=True, out_dtype=jnp.float32):
    """3x3 conv (stride=1, padding=dilation, dilation) + BN (+ReLU), fused."""
    B, H, W, Cin = x.shape
    Cout = w.shape[0]
    d = dilation
    Hp, Wp = H + 2 * d, W + 2 * d

    m_out = (H - 1) * Wp + W                 # span of rows r = h*Wp + w
    m_out_p = _round_up(m_out, 8)
    rows = Hp * Wp + (m_out_p - m_out)       # extra zero rows keep taps in range

    xp = jnp.pad(x, ((0, 0), (d, d), (d, d), (0, 0)))
    xflat = xp.reshape(B, Hp * Wp, Cin)
    if rows > Hp * Wp:
        xflat = jnp.pad(xflat, ((0, 0), (0, rows - Hp * Wp), (0, 0)))
    xflat = xflat.astype(jnp.bfloat16)

    scale, bias = _fold_bn(bn)
    wmat = (jnp.transpose(w, (2, 3, 1, 0)).reshape(9, Cin, Cout)
            * scale[None, None, :]).astype(jnp.bfloat16)
    bias2d = bias.reshape(1, Cout)

    kern = functools.partial(_conv3x3_kernel, Wp=Wp, d=d, m_out=m_out_p,
                             relu=relu)
    out = pl.pallas_call(
        kern,
        out_shape=jax.ShapeDtypeStruct((B, m_out_p, Cout), out_dtype),
        grid_spec=pltpu.PrefetchScalarGridSpec(
            num_scalar_prefetch=0,
            grid=(B,),
            in_specs=[
                pl.BlockSpec((None, rows, Cin), lambda b: (b, 0, 0)),
                pl.BlockSpec((9, Cin, Cout), lambda b: (0, 0, 0)),
                pl.BlockSpec((1, Cout), lambda b: (0, 0)),
            ],
            out_specs=pl.BlockSpec((None, m_out_p, Cout), lambda b: (b, 0, 0)),
        ),
        compiler_params=pltpu.CompilerParams(
            dimension_semantics=("parallel",)),
        cost_estimate=pl.CostEstimate(
            flops=2 * B * m_out_p * Cout * 9 * Cin, transcendentals=0,
            bytes_accessed=int(xflat.size * 2 + wmat.size * 2
                               + B * m_out_p * Cout
                               * jnp.dtype(out_dtype).itemsize)),
    )(xflat, wmat, bias2d)

    # keep rows r = h*Wp + w, drop the horizontally-padded columns
    if m_out_p >= H * Wp:
        out = out[:, :H * Wp, :]
    else:
        out = jnp.pad(out, ((0, 0), (0, H * Wp - m_out_p), (0, 0)))
    return out.reshape(B, H, Wp, Cout)[:, :, :W, :]


# --------------------------------------------------------------------------
# Bottleneck forward (matches the PyTorch module: stride on conv1, dilation on
# conv2, optional downsample = 1x1 conv(stride) + BN on the residual path).
# --------------------------------------------------------------------------
def bottleneck(x, p, stride=1, dilation=1):
    out = conv1x1_bn_act(x, p['conv1_w'], p['bn1'], stride=stride, relu=True,
                         out_dtype=jnp.bfloat16)
    out = conv3x3_bn_act(out, p['conv2_w'], p['bn2'], dilation=dilation,
                         relu=True, out_dtype=jnp.bfloat16)
    if 'down_w' in p:
        residual = conv1x1_bn_act(x, p['down_w'], p['down_bn'], stride=stride,
                                  relu=False, out_dtype=jnp.float32)
    else:
        residual = x
    out = conv1x1_bn_act(out, p['conv3_w'], p['bn3'], relu=True,
                         residual=residual, out_dtype=jnp.float32)
    return out


# --------------------------------------------------------------------------
# Pure-JAX reference (same bf16 quantization points, f32 accumulation).
# --------------------------------------------------------------------------
def _conv_ref(x, w, bn, stride=1, padding=0, dilation=1):
    scale, bias = _fold_bn(bn)
    w_hwio = (jnp.transpose(w, (2, 3, 1, 0))
              * scale[None, None, None, :]).astype(jnp.bfloat16)
    y = lax.conv_general_dilated(
        x.astype(jnp.bfloat16), w_hwio,
        window_strides=(stride, stride),
        padding=[(padding, padding), (padding, padding)],
        rhs_dilation=(dilation, dilation),
        dimension_numbers=('NHWC', 'HWIO', 'NHWC'),
        preferred_element_type=jnp.float32)
    return y + bias[None, None, None, :]


def bottleneck_ref(x, p, stride=1, dilation=1):
    out = jax.nn.relu(_conv_ref(x, p['conv1_w'], p['bn1'], stride=stride))
    out = jax.nn.relu(_conv_ref(out, p['conv2_w'], p['bn2'],
                                padding=dilation, dilation=dilation))
    out = _conv_ref(out, p['conv3_w'], p['bn3'])
    if 'down_w' in p:
        residual = _conv_ref(x, p['down_w'], p['down_bn'], stride=stride)
    else:
        residual = x
    return jax.nn.relu(out + residual)


# --------------------------------------------------------------------------
# Parameters (eval-mode BN stats randomized so the fold is actually exercised)
# --------------------------------------------------------------------------
def init_bottleneck_params(key, in_planes, planes, with_downsample):
    ks = iter(jax.random.split(key, 32))

    def conv_w(cout, cin, kh, kw):
        fan_in = cin * kh * kw
        return (jax.random.normal(next(ks), (cout, cin, kh, kw), jnp.float32)
                / jnp.sqrt(fan_in))

    def bn(c):
        return {
            'g': 1.0 + 0.1 * jax.random.normal(next(ks), (c,), jnp.float32),
            'b': 0.1 * jax.random.normal(next(ks), (c,), jnp.float32),
            'm': 0.1 * jax.random.normal(next(ks), (c,), jnp.float32),
            'v': 1.0 + 0.1 * jax.random.uniform(next(ks), (c,), jnp.float32),
        }

    p = {
        'conv1_w': conv_w(planes, in_planes, 1, 1), 'bn1': bn(planes),
        'conv2_w': conv_w(planes, planes, 3, 3),    'bn2': bn(planes),
        'conv3_w': conv_w(planes * 4, planes, 1, 1), 'bn3': bn(planes * 4),
    }
    if with_downsample:
        p['down_w'] = conv_w(planes * 4, in_planes, 1, 1)
        p['down_bn'] = bn(planes * 4)
    return p


if __name__ == "__main__":
    key = jax.random.PRNGKey(0)
    pkey, xkey = jax.random.split(key)

    B, in_planes, planes = 2, 64, 32
    H = W = 16
    stride, dilation = 2, 1

    params = init_bottleneck_params(pkey, in_planes, planes,
                                    with_downsample=True)
    x_nchw = jax.random.normal(xkey, (B, in_planes, H, W), jnp.float32)

    def forward(params, x_nchw):
        x = jnp.transpose(x_nchw, (0, 2, 3, 1))          # NCHW -> NHWC
        y = bottleneck(x, params, stride=stride, dilation=dilation)
        return jnp.transpose(y, (0, 3, 1, 2))            # back to NCHW

    def forward_ref(params, x_nchw):
        x = jnp.transpose(x_nchw, (0, 2, 3, 1))
        y = bottleneck_ref(x, params, stride=stride, dilation=dilation)
        return jnp.transpose(y, (0, 3, 1, 2))

    out = jax.block_until_ready(jax.jit(forward)(params, x_nchw))
    ref = jax.block_until_ready(jax.jit(forward_ref)(params, x_nchw))

    assert out.shape == (B, planes * 4, H // stride, W // stride), out.shape
    assert bool(jnp.all(jnp.isfinite(out)))
    err = float(jnp.max(jnp.abs(out - ref)))
    ref_scale = float(jnp.max(jnp.abs(ref))) + 1e-6
    assert err <= 2e-2 * ref_scale + 2e-3, (err, ref_scale)

    print("KERNEL_OK")
</pallas_src>

<mosaic_0001>
module attributes {stable_mosaic.version = 11 : i64} {
  func.func @_gemm_kernel(%arg0: i32, %arg1: i32, %arg2: memref<128x64xbf16, #tpu.memory_space<vmem>>, %arg3: memref<64x32xbf16, #tpu.memory_space<vmem>>, %arg4: memref<1x32xf32, #tpu.memory_space<vmem>>, %arg5: memref<128x32xbf16, #tpu.memory_space<vmem>>) attributes {dimension_semantics = [#tpu.dimension_semantics<parallel>, #tpu.dimension_semantics<parallel>], iteration_bounds = array<i64: 1, 1>, scalar_prefetch = 0 : i64, scratch_operands = 0 : i64, tpu.core_type = #tpu.core_type<tc>, window_params = [{transform_indices = @transform_0, window_bounds = array<i64: 128, 64>}, {transform_indices = @transform_1, window_bounds = array<i64: 64, 32>}, {transform_indices = @transform_2, window_bounds = array<i64: 1, 32>}, {transform_indices = @transform_3, window_bounds = array<i64: 128, 32>}]} {
    %c0 = arith.constant 0 : index
    %c0_0 = arith.constant 0 : index
    %0 = vector.load %arg2[%c0, %c0_0] : memref<128x64xbf16, #tpu.memory_space<vmem>>, vector<128x64xbf16>
    %c0_1 = arith.constant 0 : index
    %c0_2 = arith.constant 0 : index
    %1 = vector.load %arg3[%c0_1, %c0_2] : memref<64x32xbf16, #tpu.memory_space<vmem>>, vector<64x32xbf16>
    %cst = arith.constant dense<0.000000e+00> : vector<128x32xf32>
    %2 = tpu.matmul %0, %1, %cst {dimension_numbers = #tpu.dot_dimension_numbers<[1], [0], [0], [1], [0, 0, 1, 1], [], []>} : vector<128x64xbf16>, vector<64x32xbf16>, vector<128x32xf32> -> vector<128x32xf32>
    %c0_3 = arith.constant 0 : index
    %c0_4 = arith.constant 0 : index
    %3 = vector.load %arg4[%c0_3, %c0_4] : memref<1x32xf32, #tpu.memory_space<vmem>>, vector<1x32xf32>
    %4 = vector.broadcast %3 : vector<1x32xf32> to vector<128x32xf32>
    %5 = arith.addf %2, %4 : vector<128x32xf32>
    %cst_5 = arith.constant 0.000000e+00 : f32
    %6 = vector.broadcast %cst_5 : f32 to vector<128x32xf32>
    %7 = arith.maximumf %5, %6 : vector<128x32xf32>
    %8 = arith.truncf %7 : vector<128x32xf32> to vector<128x32xbf16>
    %c0_6 = arith.constant 0 : index
    %c0_7 = arith.constant 0 : index
    %9 = vector.load %arg5[%c0_6, %c0_7] : memref<128x32xbf16, #tpu.memory_space<vmem>>, vector<128x32xbf16>
    tpu.vector_store %arg5[%c0_6, %c0_7], %8 {strides = array<i32>} : memref<128x32xbf16, #tpu.memory_space<vmem>>, vector<128x32xbf16>,
    return
  }
  func.func @transform_0(%arg0: i32, %arg1: i32) -> (i32, i32) {
    %c0_i32 = arith.constant 0 : i32
    %c0_i32_0 = arith.constant 0 : i32
    return %arg0, %c0_i32 : i32, i32
  }
  func.func @transform_1(%arg0: i32, %arg1: i32) -> (i32, i32) {
    %c0_i32 = arith.constant 0 : i32
    %c0_i32_0 = arith.constant 0 : i32
    return %c0_i32, %arg1 : i32, i32
  }
  func.func @transform_2(%arg0: i32, %arg1: i32) -> (i32, i32) {
    %c0_i32 = arith.constant 0 : i32
    %c0_i32_0 = arith.constant 0 : i32
    return %c0_i32, %arg1 : i32, i32
  }
  func.func @transform_3(%arg0: i32, %arg1: i32) -> (i32, i32) {
    %c0_i32 = arith.constant 0 : i32
    return %arg0, %arg1 : i32, i32
  }
}

module attributes {stable_mosaic.version = 11 : i64} {
  func.func @_conv3x3_kernel(%arg0: i32, %arg1: memref<1x102x32xbf16, #tpu.memory_space<vmem>>, %arg2: memref<9x32x32xbf16, #tpu.memory_space<vmem>>, %arg3: memref<1x32xf32, #tpu.memory_space<vmem>>, %arg4: memref<1x80x32xbf16, #tpu.memory_space<vmem>>) attributes {dimension_semantics = [#tpu.dimension_semantics<parallel>], iteration_bounds = array<i64: 2>, scalar_prefetch = 0 : i64, scratch_operands = 0 : i64, tpu.core_type = #tpu.core_type<tc>, window_params = [{transform_indices = @transform_0, window_bounds = array<i64: 1, 102, 32>}, {pipeline_mode = #tpu.pipeline_mode<synchronous>, transform_indices = @transform_1, window_bounds = array<i64: 9, 32, 32>}, {pipeline_mode = #tpu.pipeline_mode<synchronous>, transform_indices = @transform_2, window_bounds = array<i64: 1, 32>}, {transform_indices = @transform_3, window_bounds = array<i64: 1, 80, 32>}]} {
    %cst = arith.constant 0.000000e+00 : f32
    %0 = vector.broadcast %cst : f32 to vector<80x32xf32>
    %c0 = arith.constant 0 : index
    %c0_0 = arith.constant 0 : index
    %c0_1 = arith.constant 0 : index
    %1 = vector.load %arg1[%c0, %c0_0, %c0_1] : memref<1x102x32xbf16, #tpu.memory_space<vmem>>, vector<1x80x32xbf16>
    %2 = vector.shape_cast %1 : vector<1x80x32xbf16> to vector<80x32xbf16>
    %c0_2 = arith.constant 0 : index
    %c0_3 = arith.constant 0 : index
    %c0_4 = arith.constant 0 : index
    %3 = vector.load %arg2[%c0_2, %c0_3, %c0_4] : memref<9x32x32xbf16, #tpu.memory_space<vmem>>, vector<1x32x32xbf16>
    %4 = vector.shape_cast %3 : vector<1x32x32xbf16> to vector<32x32xbf16>
    %cst_5 = arith.constant dense<0.000000e+00> : vector<80x32xf32>
    %5 = tpu.matmul %2, %4, %cst_5 {dimension_numbers = #tpu.dot_dimension_numbers<[1], [0], [0], [1], [0, 0, 1, 1], [], []>} : vector<80x32xbf16>, vector<32x32xbf16>, vector<80x32xf32> -> vector<80x32xf32>
    %6 = arith.addf %0, %5 : vector<80x32xf32>
    %c0_6 = arith.constant 0 : index
    %c1 = arith.constant 1 : index
    %c0_7 = arith.constant 0 : index
    %7 = vector.load %arg1[%c0_6, %c1, %c0_7] : memref<1x102x32xbf16, #tpu.memory_space<vmem>>, vector<1x80x32xbf16>
    %8 = vector.shape_cast %7 : vector<1x80x32xbf16> to vector<80x32xbf16>
    %c1_8 = arith.constant 1 : index
    %c0_9 = arith.constant 0 : index
    %c0_10 = arith.constant 0 : index
    %9 = vector.load %arg2[%c1_8, %c0_9, %c0_10] : memref<9x32x32xbf16, #tpu.memory_space<vmem>>, vector<1x32x32xbf16>
    %10 = vector.shape_cast %9 : vector<1x32x32xbf16> to vector<32x32xbf16>
    %cst_11 = arith.constant dense<0.000000e+00> : vector<80x32xf32>
    %11 = tpu.matmul %8, %10, %cst_11 {dimension_numbers = #tpu.dot_dimension_numbers<[1], [0], [0], [1], [0, 0, 1, 1], [], []>} : vector<80x32xbf16>, vector<32x32xbf16>, vector<80x32xf32> -> vector<80x32xf32>
    %12 = arith.addf %6, %11 : vector<80x32xf32>
    %c0_12 = arith.constant 0 : index
    %c2 = arith.constant 2 : index
    %c0_13 = arith.constant 0 : index
    %13 = vector.load %arg1[%c0_12, %c2, %c0_13] : memref<1x102x32xbf16, #tpu.memory_space<vmem>>, vector<1x80x32xbf16>
    %14 = vector.shape_cast %13 : vector<1x80x32xbf16> to vector<80x32xbf16>
    %c2_14 = arith.constant 2 : index
    %c0_15 = arith.constant 0 : index
    %c0_16 = arith.constant 0 : index
    %15 = vector.load %arg2[%c2_14, %c0_15, %c0_16] : memref<9x32x32xbf16, #tpu.memory_space<vmem>>, vector<1x32x32xbf16>
    %16 = vector.shape_cast %15 : vector<1x32x32xbf16> to vector<32x32xbf16>
    %cst_17 = arith.constant dense<0.000000e+00> : vector<80x32xf32>
    %17 = tpu.matmul %14, %16, %cst_17 {dimension_numbers = #tpu.dot_dimension_numbers<[1], [0], [0], [1], [0, 0, 1, 1], [], []>} : vector<80x32xbf16>, vector<32x32xbf16>, vector<80x32xf32> -> vector<80x32xf32>
    %18 = arith.addf %12, %17 : vector<80x32xf32>
    %c0_18 = arith.constant 0 : index
    %c10 = arith.constant 10 : index
    %c0_19 = arith.constant 0 : index
    %19 = vector.load %arg1[%c0_18, %c10, %c0_19] : memref<1x102x32xbf16, #tpu.memory_space<vmem>>, vector<1x80x32xbf16>
    %20 = vector.shape_cast %19 : vector<1x80x32xbf16> to vector<80x32xbf16>
    %c3 = arith.constant 3 : index
    %c0_20 = arith.constant 0 : index
    %c0_21 = arith.constant 0 : index
    %21 = vector.load %arg2[%c3, %c0_20, %c0_21] : memref<9x32x32xbf16, #tpu.memory_space<vmem>>, vector<1x32x32xbf16>
    %22 = vector.shape_cast %21 : vector<1x32x32xbf16> to vector<32x32xbf16>
    %cst_22 = arith.constant dense<0.000000e+00> : vector<80x32xf32>
    %23 = tpu.matmul %20, %22, %cst_22 {dimension_numbers = #tpu.dot_dimension_numbers<[1], [0], [0], [1], [0, 0, 1, 1], [], []>} : vector<80x32xbf16>, vector<32x32xbf16>, vector<80x32xf32> -> vector<80x32xf32>
    %24 = arith.addf %18, %23 : vector<80x32xf32>
    %c0_23 = arith.constant 0 : index
    %c11 = arith.constant 11 : index
    %c0_24 = arith.constant 0 : index
    %25 = vector.load %arg1[%c0_23, %c11, %c0_24] : memref<1x102x32xbf16, #tpu.memory_space<vmem>>, vector<1x80x32xbf16>
    %26 = vector.shape_cast %25 : vector<1x80x32xbf16> to vector<80x32xbf16>
    %c4 = arith.constant 4 : index
    %c0_25 = arith.constant 0 : index
    %c0_26 = arith.constant 0 : index
    %27 = vector.load %arg2[%c4, %c0_25, %c0_26] : memref<9x32x32xbf16, #tpu.memory_space<vmem>>, vector<1x32x32xbf16>
    %28 = vector.shape_cast %27 : vector<1x32x32xbf16> to vector<32x32xbf16>
    %cst_27 = arith.constant dense<0.000000e+00> : vector<80x32xf32>
    %29 = tpu.matmul %26, %28, %cst_27 {dimension_numbers = #tpu.dot_dimension_numbers<[1], [0], [0], [1], [0, 0, 1, 1], [], []>} : vector<80x32xbf16>, vector<32x32xbf16>, vector<80x32xf32> -> vector<80x32xf32>
    %30 = arith.addf %24, %29 : vector<80x32xf32>
    %c0_28 = arith.constant 0 : index
    %c12 = arith.constant 12 : index
    %c0_29 = arith.constant 0 : index
    %31 = vector.load %arg1[%c0_28, %c12, %c0_29] : memref<1x102x32xbf16, #tpu.memory_space<vmem>>, vector<1x80x32xbf16>
    %32 = vector.shape_cast %31 : vector<1x80x32xbf16> to vector<80x32xbf16>
    %c5 = arith.constant 5 : index
    %c0_30 = arith.constant 0 : index
    %c0_31 = arith.constant 0 : index
    %33 = vector.load %arg2[%c5, %c0_30, %c0_31] : memref<9x32x32xbf16, #tpu.memory_space<vmem>>, vector<1x32x32xbf16>
    %34 = vector.shape_cast %33 : vector<1x32x32xbf16> to vector<32x32xbf16>
    %cst_32 = arith.constant dense<0.000000e+00> : vector<80x32xf32>
    %35 = tpu.matmul %32, %34, %cst_32 {dimension_numbers = #tpu.dot_dimension_numbers<[1], [0], [0], [1], [0, 0, 1, 1], [], []>} : vector<80x32xbf16>, vector<32x32xbf16>, vector<80x32xf32> -> vector<80x32xf32>
    %36 = arith.addf %30, %35 : vector<80x32xf32>
    %c0_33 = arith.constant 0 : index
    %c20 = arith.constant 20 : index
    %c0_34 = arith.constant 0 : index
    %37 = vector.load %arg1[%c0_33, %c20, %c0_34] : memref<1x102x32xbf16, #tpu.memory_space<vmem>>, vector<1x80x32xbf16>
    %38 = vector.shape_cast %37 : vector<1x80x32xbf16> to vector<80x32xbf16>
    %c6 = arith.constant 6 : index
    %c0_35 = arith.constant 0 : index
    %c0_36 = arith.constant 0 : index
    %39 = vector.load %arg2[%c6, %c0_35, %c0_36] : memref<9x32x32xbf16, #tpu.memory_space<vmem>>, vector<1x32x32xbf16>
    %40 = vector.shape_cast %39 : vector<1x32x32xbf16> to vector<32x32xbf16>
    %cst_37 = arith.constant dense<0.000000e+00> : vector<80x32xf32>
    %41 = tpu.matmul %38, %40, %cst_37 {dimension_numbers = #tpu.dot_dimension_numbers<[1], [0], [0], [1], [0, 0, 1, 1], [], []>} : vector<80x32xbf16>, vector<32x32xbf16>, vector<80x32xf32> -> vector<80x32xf32>
    %42 = arith.addf %36, %41 : vector<80x32xf32>
    %c0_38 = arith.constant 0 : index
    %c21 = arith.constant 21 : index
    %c0_39 = arith.constant 0 : index
    %43 = vector.load %arg1[%c0_38, %c21, %c0_39] : memref<1x102x32xbf16, #tpu.memory_space<vmem>>, vector<1x80x32xbf16>
    %44 = vector.shape_cast %43 : vector<1x80x32xbf16> to vector<80x32xbf16>
    %c7 = arith.constant 7 : index
    %c0_40 = arith.constant 0 : index
    %c0_41 = arith.constant 0 : index
    %45 = vector.load %arg2[%c7, %c0_40, %c0_41] : memref<9x32x32xbf16, #tpu.memory_space<vmem>>, vector<1x32x32xbf16>
    %46 = vector.shape_cast %45 : vector<1x32x32xbf16> to vector<32x32xbf16>
    %cst_42 = arith.constant dense<0.000000e+00> : vector<80x32xf32>
    %47 = tpu.matmul %44, %46, %cst_42 {dimension_numbers = #tpu.dot_dimension_numbers<[1], [0], [0], [1], [0, 0, 1, 1], [], []>} : vector<80x32xbf16>, vector<32x32xbf16>, vector<80x32xf32> -> vector<80x32xf32>
    %48 = arith.addf %42, %47 : vector<80x32xf32>
    %c0_43 = arith.constant 0 : index
    %c22 = arith.constant 22 : index
    %c0_44 = arith.constant 0 : index
    %49 = vector.load %arg1[%c0_43, %c22, %c0_44] : memref<1x102x32xbf16, #tpu.memory_space<vmem>>, vector<1x80x32xbf16>
    %50 = vector.shape_cast %49 : vector<1x80x32xbf16> to vector<80x32xbf16>
    %c8 = arith.constant 8 : index
    %c0_45 = arith.constant 0 : index
    %c0_46 = arith.constant 0 : index
    %51 = vector.load %arg2[%c8, %c0_45, %c0_46] : memref<9x32x32xbf16, #tpu.memory_space<vmem>>, vector<1x32x32xbf16>
    %52 = vector.shape_cast %51 : vector<1x32x32xbf16> to vector<32x32xbf16>
    %cst_47 = arith.constant dense<0.000000e+00> : vector<80x32xf32>
    %53 = tpu.matmul %50, %52, %cst_47 {dimension_numbers = #tpu.dot_dimension_numbers<[1], [0], [0], [1], [0, 0, 1, 1], [], []>} : vector<80x32xbf16>, vector<32x32xbf16>, vector<80x32xf32> -> vector<80x32xf32>
    %54 = arith.addf %48, %53 : vector<80x32xf32>
    %c0_48 = arith.constant 0 : index
    %c0_49 = arith.constant 0 : index
    %55 = vector.load %arg3[%c0_48, %c0_49] : memref<1x32xf32, #tpu.memory_space<vmem>>, vector<1x32xf32>
    %56 = vector.broadcast %55 : vector<1x32xf32> to vector<80x32xf32>
    %57 = arith.addf %54, %56 : vector<80x32xf32>
    %cst_50 = arith.constant 0.000000e+00 : f32
    %58 = vector.broadcast %cst_50 : f32 to vector<80x32xf32>
    %59 = arith.maximumf %57, %58 : vector<80x32xf32>
    %60 = arith.truncf %59 : vector<80x32xf32> to vector<80x32xbf16>
    %c0_51 = arith.constant 0 : index
    %c0_52 = arith.constant 0 : index
    %c0_53 = arith.constant 0 : index
    %61 = vector.load %arg4[%c0_51, %c0_52, %c0_53] : memref<1x80x32xbf16, #tpu.memory_space<vmem>>, vector<1x80x32xbf16>
    %62 = vector.shape_cast %61 : vector<1x80x32xbf16> to vector<80x32xbf16>
    %63 = vector.shape_cast %60 : vector<80x32xbf16> to vector<1x80x32xbf16>
    tpu.vector_store %arg4[%c0_51, %c0_52, %c0_53], %63 {strides = array<i32>} : memref<1x80x32xbf16, #tpu.memory_space<vmem>>, vector<1x80x32xbf16>,
    return
  }
  func.func @transform_0(%arg0: i32) -> (i32, i32, i32) {
    %c0_i32 = arith.constant 0 : i32
    %c0_i32_0 = arith.constant 0 : i32
    %c0_i32_1 = arith.constant 0 : i32
    return %arg0, %c0_i32, %c0_i32_0 : i32, i32, i32
  }
  func.func @transform_1(%arg0: i32) -> (i32, i32, i32) {
    %c0_i32 = arith.constant 0 : i32
    %c0_i32_0 = arith.constant 0 : i32
    %c0_i32_1 = arith.constant 0 : i32
    %c0_i32_2 = arith.constant 0 : i32
    return %c0_i32, %c0_i32_0, %c0_i32_1 : i32, i32, i32
  }
  func.func @transform_2(%arg0: i32) -> (i32, i32) {
    %c0_i32 = arith.constant 0 : i32
    %c0_i32_0 = arith.constant 0 : i32
    %c0_i32_1 = arith.constant 0 : i32
    return %c0_i32, %c0_i32_0 : i32, i32
  }
  func.func @transform_3(%arg0: i32) -> (i32, i32, i32) {
    %c0_i32 = arith.constant 0 : i32
    %c0_i32_0 = arith.constant 0 : i32
    %c0_i32_1 = arith.constant 0 : i32
    return %arg0, %c0_i32, %c0_i32_0 : i32, i32, i32
  }
}

module attributes {stable_mosaic.version = 11 : i64} {
  func.func @_gemm_kernel(%arg0: i32, %arg1: i32, %arg2: memref<128x64xbf16, #tpu.memory_space<vmem>>, %arg3: memref<64x128xbf16, #tpu.memory_space<vmem>>, %arg4: memref<1x128xf32, #tpu.memory_space<vmem>>, %arg5: memref<128x128xf32, #tpu.memory_space<vmem>>) attributes {dimension_semantics = [#tpu.dimension_semantics<parallel>, #tpu.dimension_semantics<parallel>], iteration_bounds = array<i64: 1, 1>, scalar_prefetch = 0 : i64, scratch_operands = 0 : i64, tpu.core_type = #tpu.core_type<tc>, window_params = [{transform_indices = @transform_0, window_bounds = array<i64: 128, 64>}, {transform_indices = @transform_1, window_bounds = array<i64: 64, 128>}, {transform_indices = @transform_2, window_bounds = array<i64: 1, 128>}, {transform_indices = @transform_3, window_bounds = array<i64: 128, 128>}]} {
    %c0 = arith.constant 0 : index
    %c0_0 = arith.constant 0 : index
    %0 = vector.load %arg2[%c0, %c0_0] : memref<128x64xbf16, #tpu.memory_space<vmem>>, vector<128x64xbf16>
    %c0_1 = arith.constant 0 : index
    %c0_2 = arith.constant 0 : index
    %1 = vector.load %arg3[%c0_1, %c0_2] : memref<64x128xbf16, #tpu.memory_space<vmem>>, vector<64x128xbf16>
    %cst = arith.constant dense<0.000000e+00> : vector<128x128xf32>
    %2 = tpu.matmul %0, %1, %cst {dimension_numbers = #tpu.dot_dimension_numbers<[1], [0], [0], [1], [0, 0, 1, 1], [], []>} : vector<128x64xbf16>, vector<64x128xbf16>, vector<128x128xf32> -> vector<128x128xf32>
    %c0_3 = arith.constant 0 : index
    %c0_4 = arith.constant 0 : index
    %3 = vector.load %arg4[%c0_3, %c0_4] : memref<1x128xf32, #tpu.memory_space<vmem>>, vector<1x128xf32>
    %4 = vector.broadcast %3 : vector<1x128xf32> to vector<128x128xf32>
    %5 = arith.addf %2, %4 : vector<128x128xf32>
    %c0_5 = arith.constant 0 : index
    %c0_6 = arith.constant 0 : index
    %6 = vector.load %arg5[%c0_5, %c0_6] : memref<128x128xf32, #tpu.memory_space<vmem>>, vector<128x128xf32>
    tpu.vector_store %arg5[%c0_5, %c0_6], %5 {strides = array<i32>} : memref<128x128xf32, #tpu.memory_space<vmem>>, vector<128x128xf32>,
    return
  }
  func.func @transform_0(%arg0: i32, %arg1: i32) -> (i32, i32) {
    %c0_i32 = arith.constant 0 : i32
    %c0_i32_0 = arith.constant 0 : i32
    return %arg0, %c0_i32 : i32, i32
  }
  func.func @transform_1(%arg0: i32, %arg1: i32) -> (i32, i32) {
    %c0_i32 = arith.constant 0 : i32
    %c0_i32_0 = arith.constant 0 : i32
    return %c0_i32, %arg1 : i32, i32
  }
  func.func @transform_2(%arg0: i32, %arg1: i32) -> (i32, i32) {
    %c0_i32 = arith.constant 0 : i32
    %c0_i32_0 = arith.constant 0 : i32
    return %c0_i32, %arg1 : i32, i32
  }
  func.func @transform_3(%arg0: i32, %arg1: i32) -> (i32, i32) {
    %c0_i32 = arith.constant 0 : i32
    return %arg0, %arg1 : i32, i32
  }
}

module attributes {stable_mosaic.version = 11 : i64} {
  func.func @_gemm_res_kernel(%arg0: i32, %arg1: i32, %arg2: memref<128x32xbf16, #tpu.memory_space<vmem>>, %arg3: memref<32x128xbf16, #tpu.memory_space<vmem>>, %arg4: memref<1x128xf32, #tpu.memory_space<vmem>>, %arg5: memref<128x128xf32, #tpu.memory_space<vmem>>, %arg6: memref<128x128xf32, #tpu.memory_space<vmem>>) attributes {dimension_semantics = [#tpu.dimension_semantics<parallel>, #tpu.dimension_semantics<parallel>], iteration_bounds = array<i64: 1, 1>, scalar_prefetch = 0 : i64, scratch_operands = 0 : i64, tpu.core_type = #tpu.core_type<tc>, window_params = [{transform_indices = @transform_0, window_bounds = array<i64: 128, 32>}, {transform_indices = @transform_1, window_bounds = array<i64: 32, 128>}, {transform_indices = @transform_2, window_bounds = array<i64: 1, 128>}, {transform_indices = @transform_3, window_bounds = array<i64: 128, 128>}, {transform_indices = @transform_4, window_bounds = array<i64: 128, 128>}]} {
    %c0 = arith.constant 0 : index
    %c0_0 = arith.constant 0 : index
    %0 = vector.load %arg2[%c0, %c0_0] : memref<128x32xbf16, #tpu.memory_space<vmem>>, vector<128x32xbf16>
    %c0_1 = arith.constant 0 : index
    %c0_2 = arith.constant 0 : index
    %1 = vector.load %arg3[%c0_1, %c0_2] : memref<32x128xbf16, #tpu.memory_space<vmem>>, vector<32x128xbf16>
    %cst = arith.constant dense<0.000000e+00> : vector<128x128xf32>
    %2 = tpu.matmul %0, %1, %cst {dimension_numbers = #tpu.dot_dimension_numbers<[1], [0], [0], [1], [0, 0, 1, 1], [], []>} : vector<128x32xbf16>, vector<32x128xbf16>, vector<128x128xf32> -> vector<128x128xf32>
    %c0_3 = arith.constant 0 : index
    %c0_4 = arith.constant 0 : index
    %3 = vector.load %arg4[%c0_3, %c0_4] : memref<1x128xf32, #tpu.memory_space<vmem>>, vector<1x128xf32>
    %4 = vector.broadcast %3 : vector<1x128xf32> to vector<128x128xf32>
    %5 = arith.addf %2, %4 : vector<128x128xf32>
    %c0_5 = arith.constant 0 : index
    %c0_6 = arith.constant 0 : index
    %6 = vector.load %arg5[%c0_5, %c0_6] : memref<128x128xf32, #tpu.memory_space<vmem>>, vector<128x128xf32>
    %7 = arith.addf %5, %6 : vector<128x128xf32>
    %cst_7 = arith.constant 0.000000e+00 : f32
    %8 = vector.broadcast %cst_7 : f32 to vector<128x128xf32>
    %9 = arith.maximumf %7, %8 : vector<128x128xf32>
    %c0_8 = arith.constant 0 : index
    %c0_9 = arith.constant 0 : index
    %10 = vector.load %arg6[%c0_8, %c0_9] : memref<128x128xf32, #tpu.memory_space<vmem>>, vector<128x128xf32>
    tpu.vector_store %arg6[%c0_8, %c0_9], %9 {strides = array<i32>} : memref<128x128xf32, #tpu.memory_space<vmem>>, vector<128x128xf32>,
    return
  }
  func.func @transform_0(%arg0: i32, %arg1: i32) -> (i32, i32) {
    %c0_i32 = arith.constant 0 : i32
    %c0_i32_0 = arith.constant 0 : i32
    return %arg0, %c0_i32 : i32, i32
  }
  func.func @transform_1(%arg0: i32, %arg1: i32) -> (i32, i32) {
    %c0_i32 = arith.constant 0 : i32
    %c0_i32_0 = arith.constant 0 : i32
    return %c0_i32, %arg1 : i32, i32
  }
  func.func @transform_2(%arg0: i32, %arg1: i32) -> (i32, i32) {
    %c0_i32 = arith.constant 0 : i32
    %c0_i32_0 = arith.constant 0 : i32
    return %c0_i32, %arg1 : i32, i32
  }
  func.func @transform_3(%arg0: i32, %arg1: i32) -> (i32, i32) {
    %c0_i32 = arith.constant 0 : i32
    return %arg0, %arg1 : i32, i32
  }
  func.func @transform_4(%arg0: i32, %arg1: i32) -> (i32, i32) {
    %c0_i32 = arith.constant 0 : i32
    return %arg0, %arg1 : i32, i32
  }
}

</mosaic_0001>

<bundles_post_ra>
// kernel: forward.4
= control target key start
LH: loop header
LB: loop body
LE: loop exit
PB: predicated region body
PF: predicated region fallthrough
CT: control target
= control target key end

     0   :  { %vm107_vm0 = vcmask 523264   ;;  %vm213_vm1 = vcmask 257024   ;;  %s464_s1 = inlined_call_operand.vmem [shape: bf16[64,32], index: 1, kind: input, shape index: {}]   ;;  %s465_s2 = inlined_call_operand.vmem [shape: f32[1,32], index: 2, kind: input, shape index: {}]   ;;  %s466_s0 = inlined_call_operand.vmem [shape: bf16[128,64], index: 0, kind: input, shape index: {}]   ;;  %s467_s3 = inlined_call_operand.vmem [shape: bf16[128,32], index: 3, kind: output, shape index: {}]  }
   0x1   :  { %v301_v0 = vld [vmem:[%s464_s1 + $0x18] sm:$0xff]  ;;  %v300_v1 = vld [vmem:[%s464_s1 + $0x10] sm:$0xff]  ;;  %v299_v2 = vld [vmem:[%s464_s1 + $0x8] sm:$0xff] }
   0x2   :  { %136 = vmatpush.bf16.msra.mxu0 %v301_v0  ;;  %302 = vmatpush.bf16.msra.mxu1 %v301_v0  ;;  %v298_v3 = vld [vmem:[%s464_s1] sm:$0xff]  ;;  %v292_v5 = vld [vmem:[%s466_s0 + $0x10] sm:$0xff]  ;;  %v291_v8 = vld [vmem:[%s466_s0 + $0x8] sm:$0xff] }
   0x3   :  { %303 = vmatpush.bf16.msra.mxu2 %v301_v0  ;;  %304 = vmatpush.bf16.msra.mxu3 %v301_v0  ;;  %v290_v4 = vld [vmem:[%s466_s0] sm:$0xff]  ;;  %v296_v7 = vld [vmem:[%s466_s0 + $0x30] sm:$0xff]  ;;  %v293_v9 = vld [vmem:[%s466_s0 + $0x18] sm:$0xff] }
   0x4   :  { %v294_v6 = vld [vmem:[%s466_s0 + $0x20] sm:$0xff]  ;;  %v295_v10 = vld [vmem:[%s466_s0 + $0x28] sm:$0xff]  ;;  %v297_v11 = vld [vmem:[%s466_s0 + $0x38] sm:$0xff] }
   0x5   :  { %v382_v12 = vld [vmem:[%s465_s2] ss:$0 sm:$0xff] }
   0x6   :  { %137 = vmatpush.bf16.msra.mxu0 %v300_v1  ;;  %305 = vmatpush.bf16.msra.mxu1 %v300_v1 }
   0x7   :  { %306 = vmatpush.bf16.msra.mxu2 %v300_v1  ;;  %307 = vmatpush.bf16.msra.mxu3 %v300_v1 }
   0xa   :  { %138 = vmatpush.bf16.msra.mxu0 %v299_v2  ;;  %308 = vmatpush.bf16.msra.mxu1 %v299_v2 }
   0xb   :  { %309 = vmatpush.bf16.msra.mxu2 %v299_v2  ;;  %310 = vmatpush.bf16.msra.mxu3 %v299_v2 }
   0xe   :  { %139 = vmatpush.bf16.msra.mxu0 %v298_v3  ;;  %311 = vmatpush.bf16.msra.mxu1 %v298_v3 }
   0xf   :  { %312 = vmatpush.bf16.msra.mxu2 %v298_v3  ;;  %313 = vmatpush.bf16.msra.mxu3 %v298_v3 }
  0x11   :  { %282 = vmatmul.msk.bf16.vlgmr.msra.gmra.mxu0 %vm107_vm0, %v290_v4  ;;  %284 = vmatmul.msk.bf16.vlgmr.msra.gmra.mxu1 %vm107_vm0, %v292_v5 }
  0x12   :  { %286 = vmatmul.msk.bf16.vlgmr.msra.gmra.mxu2 %vm107_vm0, %v294_v6  ;;  %288 = vmatmul.msk.bf16.vlgmr.msra.gmra.mxu3 %vm107_vm0, %v296_v7 }
  0x21   :  { %283 = vmatmul.msk.bf16.gmra.mxu0 %vm107_vm0, %v291_v8  ;;  %285 = vmatmul.msk.bf16.gmra.mxu1 %vm107_vm0, %v293_v9 }
  0x22   :  { %287 = vmatmul.msk.bf16.gmra.mxu2 %vm107_vm0, %v295_v10  ;;  %289 = vmatmul.msk.bf16.gmra.mxu3 %vm107_vm0, %v297_v11 }
  0x8e   :  { %v141_v13 = vpop.f32.mrf.mxu0  ;;  %v151_v14 = vpop.f32.mrf.mxu1 }
  0x8f   :  { %v142_v15 = vadd.f32 %v382_v12, %v141_v13  ;;  %v152_v16 = vadd.f32 %v382_v12, %v151_v14 }
  0x91   :  { %v181_v17 = vmax.f32 %v142_v15, 0.0  ;;  %v185_v18 = vmax.f32 %v152_v16, 0.0 }
  0x93   :  { %v197_v19 = vpack.c.bf16 %v181_v17, %v181_v17  ;;  %v201_v20 = vpack.c.bf16 %v185_v18, %v185_v18 }
  0x95   :  { %214 = vst.msk [vmem:[%s467_s3] sm:$0xf] %vm213_vm1, %v197_v19  ;;  %v161_v21 = vpop.f32.mrf.mxu2  ;;  %v171_v22 = vpop.f32.mrf.mxu3 }
  0x96   :  { %218 = vst.msk [vmem:[%s467_s3 + $0x10] sm:$0xf] %vm213_vm1, %v201_v20  ;;  %v162_v23 = vadd.f32 %v382_v12, %v161_v21  ;;  %v172_v24 = vadd.f32 %v382_v12, %v171_v22  ;;  %v143_v25 = vpop.f32.mrf.mxu0  ;;  %v153_v26 = vpop.f32.mrf.mxu1 }
  0x97   :  { %v144_v27 = vadd.f32 %v382_v12, %v143_v25  ;;  %v154_v28 = vadd.f32 %v382_v12, %v153_v26 }
  0x98   :  { %v189_v29 = vmax.f32 %v162_v23, 0.0  ;;  %v193_v30 = vmax.f32 %v172_v24, 0.0 }
  0x99   :  { %v182_v31 = vmax.f32 %v144_v27, 0.0  ;;  %v186_v32 = vmax.f32 %v154_v28, 0.0 }
  0x9a   :  { %v205_v33 = vpack.c.bf16 %v189_v29, %v189_v29  ;;  %v209_v34 = vpack.c.bf16 %v193_v30, %v193_v30 }
  0x9b   :  { %v198_v35 = vpack.c.bf16 %v182_v31, %v182_v31  ;;  %v202_v36 = vpack.c.bf16 %v186_v32, %v186_v32 }
  0x9c   :  { %222 = vst.msk [vmem:[%s467_s3 + $0x20] sm:$0xf] %vm213_vm1, %v205_v33 }
  0x9d   :  { %226 = vst.msk [vmem:[%s467_s3 + $0x30] sm:$0xf] %vm213_vm1, %v209_v34  ;;  %v163_v37 = vpop.f32.mrf.mxu2  ;;  %v173_v38 = vpop.f32.mrf.mxu3 }
  0x9e   :  { %215 = vst.msk [vmem:[%s467_s3 + $0x4] sm:$0xf] %vm213_vm1, %v198_v35  ;;  %v164_v39 = vadd.f32 %v382_v12, %v163_v37  ;;  %v174_v40 = vadd.f32 %v382_v12, %v173_v38  ;;  %v146_v41 = vpop.f32.mrf.mxu0  ;;  %v156_v42 = vpop.f32.mrf.mxu1 }
  0x9f   :  { %219 = vst.msk [vmem:[%s467_s3 + $0x14] sm:$0xf] %vm213_vm1, %v202_v36  ;;  %v147_v43 = vadd.f32 %v382_v12, %v146_v41  ;;  %v157_v44 = vadd.f32 %v382_v12, %v156_v42 }
  0xa0   :  { %v190_v45 = vmax.f32 %v164_v39, 0.0  ;;  %v194_v46 = vmax.f32 %v174_v40, 0.0 }
  0xa1   :  { %v183_v47 = vmax.f32 %v147_v43, 0.0  ;;  %v187_v48 = vmax.f32 %v157_v44, 0.0 }
  0xa2   :  { %v206_v49 = vpack.c.bf16 %v190_v45, %v190_v45  ;;  %v210_v50 = vpack.c.bf16 %v194_v46, %v194_v46 }
  0xa3   :  { %v199_v51 = vpack.c.bf16 %v183_v47, %v183_v47  ;;  %v203_v52 = vpack.c.bf16 %v187_v48, %v187_v48 }
  0xa4   :  { %223 = vst.msk [vmem:[%s467_s3 + $0x24] sm:$0xf] %vm213_vm1, %v206_v49 }
  0xa5   :  { %227 = vst.msk [vmem:[%s467_s3 + $0x34] sm:$0xf] %vm213_vm1, %v210_v50  ;;  %v166_v53 = vpop.f32.mrf.mxu2  ;;  %v176_v54 = vpop.f32.mrf.mxu3 }
  0xa6   :  { %216 = vst.msk [vmem:[%s467_s3 + $0x8] sm:$0xf] %vm213_vm1, %v199_v51  ;;  %v167_v55 = vadd.f32 %v382_v12, %v166_v53  ;;  %v177_v56 = vadd.f32 %v382_v12, %v176_v54  ;;  %v148_v57 = vpop.f32.mrf.mxu0  ;;  %v158_v58 = vpop.f32.mrf.mxu1 }
  0xa7   :  { %220 = vst.msk [vmem:[%s467_s3 + $0x18] sm:$0xf] %vm213_vm1, %v203_v52  ;;  %v149_v59 = vadd.f32 %v382_v12, %v148_v57  ;;  %v159_v60 = vadd.f32 %v382_v12, %v158_v58 }
  0xa8   :  { %v191_v61 = vmax.f32 %v167_v55, 0.0  ;;  %v195_v62 = vmax.f32 %v177_v56, 0.0 }
  0xa9   :  { %v184_v63 = vmax.f32 %v149_v59, 0.0  ;;  %v188_v0 = vmax.f32 %v159_v60, 0.0 }
  0xaa   :  { %v207_v1 = vpack.c.bf16 %v191_v61, %v191_v61  ;;  %v211_v2 = vpack.c.bf16 %v195_v62, %v195_v62 }
  0xab   :  { %v200_v3 = vpack.c.bf16 %v184_v63, %v184_v63  ;;  %v204_v4 = vpack.c.bf16 %v188_v0, %v188_v0 }
  0xac   :  { %224 = vst.msk [vmem:[%s467_s3 + $0x28] sm:$0xf] %vm213_vm1, %v207_v1 }
  0xad   :  { %228 = vst.msk [vmem:[%s467_s3 + $0x38] sm:$0xf] %vm213_vm1, %v211_v2  ;;  %v168_v5 = vpop.f32.mrf.mxu2  ;;  %v178_v6 = vpop.f32.mrf.mxu3 }
  0xae   :  { %217 = vst.msk [vmem:[%s467_s3 + $0xc] sm:$0xf] %vm213_vm1, %v200_v3  ;;  %v169_v7 = vadd.f32 %v382_v12, %v168_v5  ;;  %v179_v8 = vadd.f32 %v382_v12, %v178_v6 }
  0xaf   :  { %221 = vst.msk [vmem:[%s467_s3 + $0x1c] sm:$0xf] %vm213_vm1, %v204_v4 }
  0xb0   :  { %v192_v9 = vmax.f32 %v169_v7, 0.0  ;;  %v196_v10 = vmax.f32 %v179_v8, 0.0 }
  0xb2   :  { %v208_v11 = vpack.c.bf16 %v192_v9, %v192_v9  ;;  %v212_v13 = vpack.c.bf16 %v196_v10, %v196_v10 }
  0xb4   :  { %225 = vst.msk [vmem:[%s467_s3 + $0x2c] sm:$0xf] %vm213_vm1, %v208_v11 }
  0xb5   :  { %229 = vst.msk [vmem:[%s467_s3 + $0x3c] sm:$0xf] %vm213_vm1, %v212_v13 }

// kernel: forward.6
= control target key start
LH: loop header
LB: loop body
LE: loop exit
PB: predicated region body
PF: predicated region fallthrough
CT: control target
= control target key end

     0   :  { %vm107_vm0 = vcmask 523264   ;;  %s397_s1 = inlined_call_operand.vmem [shape: bf16[64,128], index: 1, kind: input, shape index: {}]   ;;  %s398_s2 = inlined_call_operand.vmem [shape: f32[1,128], index: 2, kind: input, shape index: {}]   ;;  %s399_s0 = inlined_call_operand.vmem [shape: bf16[128,64], index: 0, kind: input, shape index: {}]   ;;  %s400_s3 = inlined_call_operand.vmem [shape: f32[128,128], index: 3, kind: output, shape index: {}]  }
   0x1   :  { %v268_v0 = vld [vmem:[%s397_s1 + $0x18] sm:$0xff]  ;;  %v267_v1 = vld [vmem:[%s397_s1 + $0x10] sm:$0xff]  ;;  %v266_v2 = vld [vmem:[%s397_s1 + $0x8] sm:$0xff] }
   0x2   :  { %136 = vmatpush.bf16.msra.mxu0 %v268_v0  ;;  %269 = vmatpush.bf16.msra.mxu1 %v268_v0  ;;  %v265_v3 = vld [vmem:[%s397_s1] sm:$0xff]  ;;  %v259_v5 = vld [vmem:[%s399_s0 + $0x10] sm:$0xff]  ;;  %v258_v8 = vld [vmem:[%s399_s0 + $0x8] sm:$0xff] }
   0x3   :  { %270 = vmatpush.bf16.msra.mxu2 %v268_v0  ;;  %271 = vmatpush.bf16.msra.mxu3 %v268_v0  ;;  %v257_v4 = vld [vmem:[%s399_s0] sm:$0xff]  ;;  %v263_v7 = vld [vmem:[%s399_s0 + $0x30] sm:$0xff]  ;;  %v260_v9 = vld [vmem:[%s399_s0 + $0x18] sm:$0xff] }
   0x4   :  { %v261_v6 = vld [vmem:[%s399_s0 + $0x20] sm:$0xff]  ;;  %v262_v10 = vld [vmem:[%s399_s0 + $0x28] sm:$0xff]  ;;  %v264_v11 = vld [vmem:[%s399_s0 + $0x38] sm:$0xff] }
   0x5   :  { %v281_v12 = vld [vmem:[%s398_s2] ss:$0 sm:$0xff] }
   0x6   :  { %137 = vmatpush.bf16.msra.mxu0 %v267_v1  ;;  %272 = vmatpush.bf16.msra.mxu1 %v267_v1 }
   0x7   :  { %273 = vmatpush.bf16.msra.mxu2 %v267_v1  ;;  %274 = vmatpush.bf16.msra.mxu3 %v267_v1 }
   0xa   :  { %138 = vmatpush.bf16.msra.mxu0 %v266_v2  ;;  %275 = vmatpush.bf16.msra.mxu1 %v266_v2 }
   0xb   :  { %276 = vmatpush.bf16.msra.mxu2 %v266_v2  ;;  %277 = vmatpush.bf16.msra.mxu3 %v266_v2 }
   0xe   :  { %139 = vmatpush.bf16.msra.mxu0 %v265_v3  ;;  %278 = vmatpush.bf16.msra.mxu1 %v265_v3 }
   0xf   :  { %279 = vmatpush.bf16.msra.mxu2 %v265_v3  ;;  %280 = vmatpush.bf16.msra.mxu3 %v265_v3 }
  0x11   :  { %249 = vmatmul.msk.bf16.vlgmr.msra.gmra.mxu0 %vm107_vm0, %v257_v4  ;;  %251 = vmatmul.msk.bf16.vlgmr.msra.gmra.mxu1 %vm107_vm0, %v259_v5 }
  0x12   :  { %253 = vmatmul.msk.bf16.vlgmr.msra.gmra.mxu2 %vm107_vm0, %v261_v6  ;;  %255 = vmatmul.msk.bf16.vlgmr.msra.gmra.mxu3 %vm107_vm0, %v263_v7 }
  0x21   :  { %250 = vmatmul.msk.bf16.gmra.mxu0 %vm107_vm0, %v258_v8  ;;  %252 = vmatmul.msk.bf16.gmra.mxu1 %vm107_vm0, %v260_v9 }
  0x22   :  { %254 = vmatmul.msk.bf16.gmra.mxu2 %vm107_vm0, %v262_v10  ;;  %256 = vmatmul.msk.bf16.gmra.mxu3 %vm107_vm0, %v264_v11 }
  0x8e   :  { %v141_v13 = vpop.f32.mrf.mxu0  ;;  %v151_v14 = vpop.f32.mrf.mxu1 }
  0x8f   :  { %v142_v15 = vadd.f32 %v281_v12, %v141_v13  ;;  %v152_v16 = vadd.f32 %v281_v12, %v151_v14 }
  0x91   :  { %181 = vst [vmem:[%s400_s3] sm:$0xff] %v142_v15 }
  0x92   :  { %185 = vst [vmem:[%s400_s3 + $0x20] sm:$0xff] %v152_v16 }
  0x95   :  { %v161_v17 = vpop.f32.mrf.mxu2  ;;  %v171_v18 = vpop.f32.mrf.mxu3 }
  0x96   :  { %v162_v19 = vadd.f32 %v281_v12, %v161_v17  ;;  %v172_v20 = vadd.f32 %v281_v12, %v171_v18  ;;  %v143_v21 = vpop.f32.mrf.mxu0  ;;  %v153_v22 = vpop.f32.mrf.mxu1 }
  0x97   :  { %v144_v23 = vadd.f32 %v281_v12, %v143_v21  ;;  %v154_v24 = vadd.f32 %v281_v12, %v153_v22 }
  0x98   :  { %189 = vst [vmem:[%s400_s3 + $0x40] sm:$0xff] %v162_v19 }
  0x99   :  { %193 = vst [vmem:[%s400_s3 + $0x60] sm:$0xff] %v172_v20 }
  0x9a   :  { %182 = vst [vmem:[%s400_s3 + $0x8] sm:$0xff] %v144_v23 }
  0x9b   :  { %186 = vst [vmem:[%s400_s3 + $0x28] sm:$0xff] %v154_v24 }
  0x9d   :  { %v163_v25 = vpop.f32.mrf.mxu2  ;;  %v173_v26 = vpop.f32.mrf.mxu3 }
  0x9e   :  { %v164_v27 = vadd.f32 %v281_v12, %v163_v25  ;;  %v174_v28 = vadd.f32 %v281_v12, %v173_v26  ;;  %v146_v29 = vpop.f32.mrf.mxu0  ;;  %v156_v30 = vpop.f32.mrf.mxu1 }
  0x9f   :  { %v147_v31 = vadd.f32 %v281_v12, %v146_v29  ;;  %v157_v32 = vadd.f32 %v281_v12, %v156_v30 }
  0xa0   :  { %190 = vst [vmem:[%s400_s3 + $0x48] sm:$0xff] %v164_v27 }
  0xa1   :  { %194 = vst [vmem:[%s400_s3 + $0x68] sm:$0xff] %v174_v28 }
  0xa2   :  { %183 = vst [vmem:[%s400_s3 + $0x10] sm:$0xff] %v147_v31 }
  0xa3   :  { %187 = vst [vmem:[%s400_s3 + $0x30] sm:$0xff] %v157_v32 }
  0xa5   :  { %v166_v33 = vpop.f32.mrf.mxu2  ;;  %v176_v34 = vpop.f32.mrf.mxu3 }
  0xa6   :  { %v167_v35 = vadd.f32 %v281_v12, %v166_v33  ;;  %v177_v36 = vadd.f32 %v281_v12, %v176_v34  ;;  %v148_v37 = vpop.f32.mrf.mxu0  ;;  %v158_v38 = vpop.f32.mrf.mxu1 }
  0xa7   :  { %v149_v39 = vadd.f32 %v281_v12, %v148_v37  ;;  %v159_v40 = vadd.f32 %v281_v12, %v158_v38 }
  0xa8   :  { %191 = vst [vmem:[%s400_s3 + $0x50] sm:$0xff] %v167_v35 }
  0xa9   :  { %195 = vst [vmem:[%s400_s3 + $0x70] sm:$0xff] %v177_v36 }
  0xaa   :  { %184 = vst [vmem:[%s400_s3 + $0x18] sm:$0xff] %v149_v39 }
  0xab   :  { %188 = vst [vmem:[%s400_s3 + $0x38] sm:$0xff] %v159_v40 }
  0xad   :  { %v168_v41 = vpop.f32.mrf.mxu2  ;;  %v178_v42 = vpop.f32.mrf.mxu3 }
  0xae   :  { %v169_v43 = vadd.f32 %v281_v12, %v168_v41  ;;  %v179_v44 = vadd.f32 %v281_v12, %v178_v42 }
  0xb0   :  { %192 = vst [vmem:[%s400_s3 + $0x58] sm:$0xff] %v169_v43 }
  0xb1   :  { %196 = vst [vmem:[%s400_s3 + $0x78] sm:$0xff] %v179_v44 }

// kernel: forward.5
= control target key start
LH: loop header
LB: loop body
LE: loop exit
PB: predicated region body
PF: predicated region fallthrough
CT: control target
= control target key end

     0   :  { %s1567_s12 = smov 0   ;;  %s1922_s0 = inlined_call_operand.vmem [shape: bf16[2,102,32], index: 0, kind: input, shape index: {}]   ;;  %s1923_s1 = inlined_call_operand.vmem [shape: bf16[9,32,32], index: 1, kind: input, shape index: {}]   ;;  %s1924_s2 = inlined_call_operand.vmem [shape: f32[1,32], index: 2, kind: input, shape index: {}]   ;;  %s1925_s3 = inlined_call_operand.vmem [shape: bf16[2,80,32], index: 3, kind: output, shape index: {}]  }
   0x1 LB: > { %s1279_s13 = sadd.s32 4294967295, %s1545_s12   ;;  %p1283_p0 = scmp.ge.s32.totalorder %s1545_s12, 1  ;;  %s1545_s12 = sphi %s1567_s12, %s13_s12  }
   0x2   : > { %p137_p1 = scmp.lt.s32.totalorder %s1545_s12, 3 }
   0x4   : > { %p138_p2 = pnand %p1283_p0, %p137_p1 }
   0x5   : > { %p161_p3 = scmp.lt.s32.totalorder (!%p138_p2), %s1279_s13, 1 }
   0x6   : > { %141 = sbr.rel (%p138_p2) target bundleno = 352 (0x160), region = 32 }
   0xb   : > { %v1492_v0 = vld [vmem:[%s1923_s1 + $0x18] sm:$0xff]  ;;  %v1491_v1 = vld [vmem:[%s1923_s1 + $0x10] sm:$0xff]  ;;  %s1927_s13 = smov (!%p161_p3, %s1279_s13), 1  ;;  %v1494_v2 = vld [vmem:[%s1923_s1 + $0x28] sm:$0xff]  ;;  %vm220_vm0 = vsmask.f32 7424 }
   0xc   : > { %1522 = vmatpush.bf16.msra.mxu1 %v1492_v0  ;;  %1523 = vmatpush.bf16.msra.mxu2 %v1492_v0  ;;  %s1528_s20 = smul.u32 52, %s1927_s13  ;;  %v1490_v3 = vld [vmem:[%s1923_s1 + $0x8] sm:$0xff]  ;;  %v1500_v4 = vld [vmem:[%s1923_s1 + $0x38] sm:$0xff]  ;;  %v1489_v6 = vld [vmem:[%s1923_s1] sm:$0xff]  ;;  %vm277_vm1 = vcmask 261120   ;;  %vm392_vm2 = vcmask 1046528  }
   0xd   : > { %1524 = vmatpush.bf16.msra.mxu3 %v1492_v0  ;;  %299 = vmatpush.bf16.msra.mxu0 %v1492_v0  ;;  %v1502_v5 = vld [vmem:[%s1923_s1 + $0x48] sm:$0xff]  ;;  %v1493_v7 = vld [vmem:[%s1923_s1 + $0x20] sm:$0xff]  ;;  %v1499_v13 = vld [vmem:[%s1923_s1 + $0x30] sm:$0xff]  ;;  %vm610_vm3 = vsmask.f32 6400  ;;  %vm744_vm4 = vcmask 1045504  }
   0xe   : > { %s1599_s29 = scalar_lea.vmem %s1922_s0, %s1528_s20  ;;  %v1501_v19 = vld [vmem:[%s1923_s1 + $0x40] sm:$0xff]  ;;  %v1510_v44 = vld [vmem:[%s1923_s1 + $0x68] sm:$0xff]  ;;  %v1512_v45 = vld [vmem:[%s1923_s1 + $0x78] sm:$0xff]  ;;  %vm962_vm5 = vsmask.f32 5376  ;;  %vm1096_vm6 = vcmask 1044480  }
   0xf   : > { %v1608_v8 = vld [vmem:[%s1599_s29 + $0x8] sm:$0xff]  ;;  %v1611_v9 = vld [vmem:[%s1599_s29 + $0x10] sm:$0xff]  ;;  %v1614_v10 = vld [vmem:[%s1599_s29 + $0x18] sm:$0xff]  ;;  %s1529_s4 = smul.u32 40, %s1927_s13  ;;  %vm1213_vm7 = vcmask 257024  }
  0x10   : > { %1525 = vmatpush.bf16.msra.mxu1 %v1491_v1  ;;  %1526 = vmatpush.bf16.msra.mxu2 %v1491_v1  ;;  %v1617_v11 = vld [vmem:[%s1599_s29 + $0x20] sm:$0xff]  ;;  %v186_v12 = vld [vmem:[%s1599_s29 + $0x28] sm:$0x1]  ;;  %v229_v14 = vshll.u32 %v1608_v8, 16  ;;  %v233_v15 = vshrl.u32 %v1608_v8, 16  ;;  %v237_v16 = vshll.u32 %v1611_v9, 16 }
  0x11   : > { %1527 = vmatpush.bf16.msra.mxu3 %v1491_v1  ;;  %300 = vmatpush.bf16.msra.mxu0 %v1491_v1  ;;  %v241_v17 = vshrl.u32 %v1611_v9, 16  ;;  %v1628_v18 = vld [vmem:[%s1599_s29] sm:$0xff]   ;;  %v245_v20 = vshll.u32 %v1614_v10, 16  ;;  %v213_v21 = vunpack.c.l.b16 %v186_v12  ;;  %v253_v22 = vshll.u32 %v1617_v11, 16  ;;  %v1639_v28 = vld [vmem:[%s1599_s29 + $0x8] sm:$0xff]   ;;  %v1504_v46 = vld [vmem:[%s1923_s1 + $0x58] sm:$0xff]  ;;  %s1880_s7 = scalar_lea.vmem %s1925_s3, %s1529_s4 }
  0x12   : > { %v257_v23 = vshrl.u32 %v1617_v11, 16  ;;  %v475_v24 = vld [vmem:[%s1599_s29 + $0x4] sm:$0xe]  ;;  %v231_v25 = vrot.slane %v229_v14, 1  ;;  %v239_v26 = vrot.slane %v237_v16, 1  ;;  %v222_v27 = vshrl.u32 %v1628_v18, 16 }
  0x13   : > { %v247_v29 = vrot.slane %v245_v20, 1  ;;  %v1641_v30 = vpack.c.b16 %v213_v21, %v213_v21  ;;  %v255_v31 = vrot.slane %v253_v22, 1  ;;  %v224_v32 = vshll.u32 %v1628_v18, 16  ;;  %v1662_v49 = vld [vmem:[%s1599_s29 + $0xc] sm:$0xff] }
  0x14   : > { %437 = vmatpush.bf16.msrb.mxu2 %v1494_v2  ;;  %355 = vmatpush.bf16.msrb.mxu1 %v1490_v3  ;;  %v235_v33 = vor.u32 %v233_v15, %v231_v25  ;;  %v243_v34 = vor.u32 %v241_v17, %v239_v26  ;;  %v502_v35 = vunpack.c.l.b16 %v475_v24  ;;  %v503_v39 = vunpack.c.l.b16 %v1639_v28  ;;  %v1514_v51 = vld [vmem:[%s1923_s1 + $0x88] sm:$0xff]  ;;  %v1509_v24 = vld [vmem:[%s1923_s1 + $0x60] sm:$0xff] }
  0x15   : > { %563 = vmatpush.bf16.msrb.mxu3 %v1500_v4  ;;  %697 = vmatpush.bf16.msrb.mxu0 %v1502_v5  ;;  %v259_v36 = vor.u32 %v257_v23, %v255_v31  ;;  %v261_v37 = vshll.u32 %v1641_v30, 16  ;;  %v226_v38 = vrot.slane %v224_v32, 1  ;;  %v620_v54 = vshrl.u32 %v1662_v49, 16  ;;  %v1519_v5 = vld [vmem:[%s1599_s29] sm:$0xf0] }
  0x16   : > { %v240_v40 = vsel %vm220_vm0, %v235_v33, %v239_v26  ;;  %v248_v41 = vsel %vm220_vm0, %v243_v34, %v247_v29  ;;  %v513_v50 = vpack.c.b16 %v503_v39, %v502_v35  ;;  %v623_v55 = vshll.u32 %v1662_v49, 16  ;;  %v1503_v26 = vld [vmem:[%s1923_s1 + $0x50] sm:$0xff] }
  0x17   : > { %1315 = vmatmul.msk.bf16.vlgmr.msra.gmra.mxu1 %vm277_vm1, %v240_v40  ;;  %1316 = vmatmul.msk.bf16.vlgmr.msra.gmra.mxu2 %vm277_vm1, %v248_v41  ;;  %v263_v42 = vrot.slane %v261_v37, 1  ;;  %v227_v43 = vor.u32 %v226_v38, %v222_v27  ;;  %v249_v56 = vshrl.u32 %v1614_v10, 16  ;;  %v622_v59 = vrot.slane %v620_v54, 1  ;;  %v1513_v40 = vld [vmem:[%s1923_s1 + $0x80] sm:$0xff] }
  0x18   : > { %438 = vmatpush.bf16.msrb.mxu2 %v1493_v7  ;;  %356 = vmatpush.bf16.msrb.mxu1 %v1489_v6  ;;  %v612_v52 = vshrl.u32 %v513_v50, 16  ;;  %v615_v53 = vshll.u32 %v513_v50, 16  ;;  %v625_v60 = vrot.slane %v623_v55, 2  ;;  %v519_v62 = vrot.slane %v513_v50, 1  ;;  %v1520_v6 = vld [vmem:[%s1599_s29] sm:$0xe] }
  0x19   : > { %564 = vmatpush.bf16.msrb.mxu3 %v1499_v13  ;;  %698 = vmatpush.bf16.msrb.mxu0 %v1501_v19  ;;  %v264_v47 = vsel %vm220_vm0, %v259_v36, %v263_v42  ;;  %v232_v48 = vsel %vm220_vm0, %v227_v43, %v231_v25  ;;  %v251_v61 = vor.u32 %v249_v56, %v247_v29  ;;  %v520_v63 = vrot.slane %v1662_v49, 1  ;;  %v1684_v7 = vld [vmem:[%s1599_s29 + $0x14] sm:$0xff]  ;;  %v1702_v25 = vld [vmem:[%s1599_s29 + $0x1c] sm:$0xff]  ;;  %v1726_v41 = vld [vmem:[%s1599_s29 + $0x24] sm:$0xff] }
  0x1a   : > { %1318 = vmatmul.msk.bf16.vlgmr.msra.gmra.mxu3 %vm277_vm1, %v264_v47  ;;  %1314 = vmatmul.msk.bf16.vlgmr.msra.gmra.mxu0 %vm277_vm1, %v232_v48  ;;  %v614_v57 = vrot.slane %v612_v52, 1  ;;  %v617_v58 = vrot.slane %v615_v53, 2  ;;  %v626_v1 = vor.u32 %v625_v60, %v622_v59  ;;  %v629_v12 = vshrl.u32 %v1684_v7, 16  ;;  %v735_v48 = vld [vmem:[%s1599_s29 + $0x4] sm:$0xc] }
  0x1b   : > { %v256_v2 = vsel %vm220_vm0, %v251_v61, %v255_v31  ;;  %v521_v3 = vsel %vm392_vm2, %v519_v62, %v520_v63  ;;  %v632_v13 = vshll.u32 %v1684_v7, 16  ;;  %v1521_v14 = vor.u32 %v1520_v6, %v1519_v5  ;;  %v601_v52 = vld [vmem:[%s1599_s29 + $0x2c] sm:$0x3]  ;;  %v827_v5 = vld [vmem:[%s1599_s29 + $0x8] sm:$0xc] }
  0x1c   : > { %915 = vmatpush.bf16.msra.mxu2 %v1510_v44  ;;  %789 = vmatpush.bf16.msra.mxu1 %v1504_v46  ;;  %v618_v0 = vor.u32 %v617_v58, %v614_v57  ;;  %v631_v15 = vrot.slane %v629_v12, 1  ;;  %v522_v19 = vrot.slane %v1684_v7, 1  ;;  %v638_v27 = vshrl.u32 %v1702_v25, 16  ;;  %v485_v62 = vld [vmem:[%s1599_s29 + $0x2c] sm:$0x1] }
  0x1d   : > { %1049 = vmatpush.bf16.msra.mxu3 %v1512_v45  ;;  %1141 = vmatpush.bf16.msra.mxu0 %v1514_v51  ;;  %v634_v16 = vrot.slane %v632_v13, 2  ;;  %v393_v17 = vrot.slane %v1521_v14, 1  ;;  %v641_v29 = vshll.u32 %v1702_v25, 16  ;;  %v396_v33 = vrot.slane %v1611_v9, 1 }
  0x1e   : > { %v627_v4 = vsel %vm610_vm3, %v618_v0, %v626_v1  ;;  %v523_v22 = vsel %vm392_vm2, %v520_v63, %v522_v19  ;;  %v640_v31 = vrot.slane %v638_v27, 1  ;;  %v524_v34 = vrot.slane %v1702_v25, 1 }
  0x1f   : > { %v635_v20 = vor.u32 %v634_v16, %v631_v15  ;;  %v643_v32 = vrot.slane %v641_v29, 2  ;;  %v402_v42 = vrot.slane %v1641_v30, 1  ;;  %v647_v43 = vshrl.u32 %v1726_v41, 16  ;;  %v1505_v16 = vld [vmem:[%s1599_s29 + $0x10] sm:$0xff] }
  0x20   : > { %916 = vmatpush.bf16.msra.mxu2 %v1509_v24  ;;  %790 = vmatpush.bf16.msra.mxu1 %v1503_v26  ;;  %v525_v37 = vsel %vm392_vm2, %v522_v19, %v524_v34  ;;  %v650_v44 = vshll.u32 %v1726_v41, 16  ;;  %v398_v50 = vrot.slane %v1614_v10, 1  ;;  %v742_v51 = vunpack.c.l.b16 %v735_v48 }
  0x21   : > { %v636_v23 = vsel %vm610_vm3, %v626_v1, %v635_v20  ;;  %v644_v35 = vor.u32 %v643_v32, %v640_v31  ;;  %1142 = vmatpush.bf16.msra.mxu0 %v1513_v40  ;;  %v649_v46 = vrot.slane %v647_v43, 1  ;;  %v526_v30 = vrot.slane %v1726_v41, 1 }
  0x22   : > { %v652_v47 = vrot.slane %v650_v44, 2  ;;  %v743_v53 = vpack.c.b16 %v503_v39, %v742_v51  ;;  %v608_v55 = vunpack.c.l.b16 %v601_v52  ;;  %v399_v56 = vsel %vm392_vm2, %v396_v33, %v398_v50  ;;  %v1788_v51 = vld [vmem:[%s1599_s29 + $0x20] sm:$0xff] }
  0x23   : > { %v645_v38 = vsel %vm610_vm3, %v635_v20, %v644_v35  ;;  %v746_v58 = vrot.slane %v1662_v49, 2  ;;  %v527_v39 = vsel %vm392_vm2, %v524_v34, %v526_v30  ;;  %v748_v49 = vrot.slane %v1684_v7, 2  ;;  %v1087_v20 = vld [vmem:[%s1599_s29 + $0x8] sm:$0x8] }
  0x24   : > { %v653_v54 = vor.u32 %v652_v47, %v649_v46  ;;  %v745_v57 = vrot.slane %v743_v53, 2  ;;  %v1751_v61 = vpack.c.b16 %v608_v55, %v608_v55  ;;  %v512_v63 = vunpack.c.l.b16 %v485_v62 }
  0x25   : > { %v749_v1 = vsel %vm744_vm4, %v746_v58, %v748_v49  ;;  %v854_v13 = vunpack.c.l.b16 %v827_v5  ;;  %v855_v14 = vunpack.c.h.b16 %v1639_v28  ;;  %v1094_v24 = vunpack.c.l.b16 %v1087_v20 }
  0x26   : > { %v747_v59 = vsel %vm744_vm4, %v745_v57, %v746_v58  ;;  %v654_v60 = vsel %vm610_vm3, %v644_v35, %v653_v54  ;;  %v659_v0 = vshll.u32 %v1751_v61, 16  ;;  %v1098_v34 = vrot.slane %v1505_v16, 3 }
  0x27   : > { %1317 = vmatmul.msk.bf16.gmra.mxu2 %vm277_vm1, %v256_v2  ;;  %1327 = vmatmul.msk.bf16.vlgmr.msrb.gmra.mxu1 %vm277_vm1, %v1628_v18  ;;  %v394_v18 = vrot.slane %v1608_v8, 1  ;;  %v518_v2 = vpack.c.b16 %v512_v63, %v512_v63  ;;  %v865_v19 = vpack.c.b16 %v855_v14, %v854_v13  ;;  %v1095_v29 = vpack.c.b16 %v855_v14, %v1094_v24  ;;  %v953_v13 = vld [vmem:[%s1599_s29 + $0x30] sm:$0x7] }
  0x28   : > { %v872_v44 = vrot.slane %v1505_v16, 2  ;;  %v990_v52 = vshrl.u32 %v1788_v51, 16  ;;  %v993_v53 = vshll.u32 %v1788_v51, 16  ;;  %v750_v55 = vrot.slane %v1702_v25, 2 }
  0x29   : > { %v395_v21 = vsel %vm392_vm2, %v393_v17, %v394_v18  ;;  %v397_v36 = vsel %vm392_vm2, %v394_v18, %v396_v33  ;;  %v528_v6 = vrot.slane %v518_v2, 1  ;;  %v964_v28 = vshrl.u32 %v865_v19, 16 }
  0x2a   : > { %1377 = vmatmul.msk.bf16.vlgmr.msrb.gmra.mxu3 %vm277_vm1, %v521_v3  ;;  %1394 = vmatmul.msk.bf16.vlgmr.msrb.gmra.mxu0 %vm277_vm1, %v627_v4  ;;  %v661_v4 = vrot.slane %v659_v0, 2  ;;  %v1097_v33 = vrot.slane %v1095_v29, 3  ;;  %v871_v43 = vrot.slane %v865_v19, 2  ;;  %v1102_v58 = vrot.slane %v1788_v51, 3 }
  0x2b   : > { %v529_v17 = vsel %vm392_vm2, %v526_v30, %v528_v6  ;;  %v992_v30 = vrot.slane %v990_v52, 2  ;;  %v752_v6 = vrot.slane %v1726_v41, 2 }
  0x2c   : > { %v873_v47 = vsel %vm744_vm4, %v871_v43, %v872_v44 }
  0x37   : > { %1328 = vmatmul.msk.bf16.gmra.mxu1 %vm277_vm1, %v1608_v8  ;;  %1344 = vmatmul.msk.bf16.vlgmr.msrb.gmra.mxu2 %vm277_vm1, %v395_v21  ;;  %v1511_v8 = vld [vmem:[%s1923_s1 + $0x70] sm:$0xff]  ;;  %v972_v21 = vshrl.u32 %v1505_v16, 16 }
  0x38   : > { %1050 = vmatpush.bf16.msra.mxu3 %v1511_v8 }
  0x39   : > { %v974_v8 = vrot.slane %v972_v21, 2 }
  0x3a   : > { %1378 = vmatmul.msk.bf16.gmra.mxu3 %vm277_vm1, %v523_v22  ;;  %1395 = vmatmul.msk.bf16.gmra.mxu0 %vm277_vm1, %v636_v23  ;;  %v967_v22 = vshll.u32 %v865_v19, 16  ;;  %v975_v23 = vshll.u32 %v1505_v16, 16  ;;  %v753_v19 = vsel %vm744_vm4, %v750_v55, %v752_v6 }
  0x3c   : > { %v969_v26 = vrot.slane %v967_v22, 3  ;;  %v977_v27 = vrot.slane %v975_v23, 3 }
  0x3e   : > { %v978_v32 = vor.u32 %v977_v27, %v974_v8 }
  0x47   : > { %1329 = vmatmul.msk.bf16.gmra.mxu1 %vm277_vm1, %v1611_v9  ;;  %1345 = vmatmul.msk.bf16.gmra.mxu2 %vm277_vm1, %v397_v36  ;;  %v400_v9 = vrot.slane %v1617_v11, 1  ;;  %v1099_v36 = vsel %vm1096_vm6, %v1097_v33, %v1098_v34 }
  0x49   : > { %v1735_v45 = vsel %vm392_vm2, %v400_v9, %v402_v42  ;;  %v401_v15 = vsel %vm392_vm2, %v398_v50, %v400_v9 }
  0x4a   : > { %1379 = vmatmul.msk.bf16.gmra.mxu3 %vm277_vm1, %v525_v37  ;;  %1396 = vmatmul.msk.bf16.gmra.mxu0 %vm277_vm1, %v645_v38  ;;  %v1506_v37 = vld [vmem:[%s1599_s29 + $0x18] sm:$0xff] }
  0x4b   : > { %v981_v38 = vshrl.u32 %v1506_v37, 16  ;;  %v984_v40 = vshll.u32 %v1506_v37, 16 }
  0x4d   : > { %v983_v9 = vrot.slane %v981_v38, 2  ;;  %v986_v42 = vrot.slane %v984_v40, 3 }
  0x4f   : > { %v987_v46 = vor.u32 %v986_v42, %v983_v9 }
  0x51   : > { %v988_v48 = vsel %vm962_vm5, %v978_v32, %v987_v46 }
  0x57   : > { %1330 = vmatmul.msk.bf16.gmra.mxu1 %vm277_vm1, %v1614_v10  ;;  %1346 = vmatmul.msk.bf16.gmra.mxu2 %vm277_vm1, %v399_v56  ;;  %v656_v10 = vshrl.u32 %v1751_v61, 16  ;;  %v874_v56 = vrot.slane %v1506_v37, 2 }
  0x59   : > { %v658_v3 = vrot.slane %v656_v10, 1  ;;  %v1805_v10 = vld [vmem:[%s1599_s29 + $0x28] sm:$0xff] }
  0x5a   : > { %1380 = vmatmul.msk.bf16.gmra.mxu3 %vm277_vm1, %v527_v39  ;;  %1397 = vmatmul.msk.bf16.gmra.mxu0 %vm277_vm1, %v654_v60  ;;  %v751_v39 = vsel %vm744_vm4, %v748_v49, %v750_v55  ;;  %v875_v60 = vsel %vm744_vm4, %v872_v44, %v874_v56  ;;  %v999_v7 = vshrl.u32 %v1805_v10, 16  ;;  %v1002_v49 = vshll.u32 %v1805_v10, 16 }
  0x5b   : > { %v662_v12 = vor.u32 %v661_v4, %v658_v3  ;;  %v1104_v16 = vrot.slane %v1805_v10, 3 }
  0x5c   : > { %v1001_v4 = vrot.slane %v999_v7, 2  ;;  %v1004_v5 = vrot.slane %v1002_v49, 3 }
  0x5d   : > { %v663_v18 = vsel %vm610_vm3, %v653_v54, %v662_v12  ;;  %v995_v54 = vrot.slane %v993_v53, 3  ;;  %v876_v12 = vrot.slane %v1788_v51, 2  ;;  %v1105_v23 = vsel %vm1096_vm6, %v1102_v58, %v1104_v16 }
  0x5f   : > { %v996_v57 = vor.u32 %v995_v54, %v992_v30  ;;  %v877_v20 = vsel %vm744_vm4, %v874_v56, %v876_v12 }
  0x61   : > { %v997_v62 = vsel %vm962_vm5, %v987_v46, %v996_v57 }
  0x67   : > { %1331 = vmatmul.msk.bf16.gmra.mxu1 %vm277_vm1, %v1617_v11  ;;  %1347 = vmatmul.msk.bf16.gmra.mxu2 %vm277_vm1, %v401_v15  ;;  %v966_v11 = vrot.slane %v964_v28, 2  ;;  %v1005_v15 = vor.u32 %v1004_v5, %v1001_v4 }
  0x69   : > { %v970_v31 = vor.u32 %v969_v26, %v966_v11  ;;  %v1006_v41 = vsel %vm962_vm5, %v996_v57, %v1005_v15 }
  0x6a   : > { %1381 = vmatmul.msk.bf16.gmra.mxu3 %vm277_vm1, %v529_v17  ;;  %1398 = vmatmul.msk.bf16.gmra.mxu0 %vm277_vm1, %v663_v18  ;;  %v960_v17 = vunpack.c.l.b16 %v953_v13 }
  0x6b   : > { %v979_v35 = vsel %vm962_vm5, %v970_v31, %v978_v32 }
  0x6c   : > { %v961_v24 = vpack.c.b16 %v960_v17, %v960_v17 }
  0x6e   : > { %v1008_v11 = vshrl.u32 %v961_v24, 16  ;;  %v1011_v26 = vshll.u32 %v961_v24, 16  ;;  %v1106_v40 = vrot.slane %v961_v24, 3 }
  0x70   : > { %v1010_v33 = vrot.slane %v1008_v11, 2 }
  0x77   : > { %1348 = vmatmul.msk.bf16.gmra.mxu2 %vm277_vm1, %v1735_v45  ;;  %1411 = vmatmul.msk.bf16.vlgmr.msra.gmra.mxu1 %vm277_vm1, %v747_v59  ;;  %v1100_v45 = vrot.slane %v1506_v37, 3 }
  0x79   : > { %v1101_v50 = vsel %vm1096_vm6, %v1098_v34, %v1100_v45  ;;  %v1103_v25 = vsel %vm1096_vm6, %v1100_v45, %v1102_v58  ;;  %v1013_v34 = vrot.slane %v1011_v26, 3  ;;  %v837_v45 = vld [vmem:[%s1599_s29 + $0x30] sm:$0x3] }
  0x7a   : > { %1461 = vmatmul.msk.bf16.vlgmr.msra.gmra.mxu3 %vm277_vm1, %v979_v35  ;;  %1478 = vmatmul.msk.bf16.vlgmr.msra.gmra.mxu0 %vm277_vm1, %v1099_v36  ;;  %v754_v35 = vrot.slane %v1751_v61, 2  ;;  %v878_v36 = vrot.slane %v1805_v10, 2 }
  0x7b   : > { %v1014_v38 = vor.u32 %v1013_v34, %v1010_v33 }
  0x7c   : > { %v755_v42 = vsel %vm744_vm4, %v752_v6, %v754_v35  ;;  %v879_v43 = vsel %vm744_vm4, %v876_v12, %v878_v36 }
  0x87   : > { %1412 = vmatmul.msk.bf16.gmra.mxu1 %vm277_vm1, %v749_v1  ;;  %1444 = vmatmul.msk.bf16.vlgmr.msra.gmra.mxu2 %vm277_vm1, %v873_v47  ;;  %v1015_v47 = vsel %vm962_vm5, %v1005_v15, %v1014_v38 }
  0x8a   : > { %1462 = vmatmul.msk.bf16.gmra.mxu3 %vm277_vm1, %v988_v48  ;;  %1479 = vmatmul.msk.bf16.gmra.mxu0 %vm277_vm1, %v1101_v50  ;;  %v1107_v48 = vsel %vm1096_vm6, %v1104_v16, %v1106_v40  ;;  %v864_v50 = vunpack.c.l.b16 %v837_v45 }
  0x8c   : > { %v870_v30 = vpack.c.b16 %v864_v50, %v864_v50 }
  0x94   : > { %v307_v59 = vpop.f32.mrf.mxu1 }
  0x97   : > { %1413 = vmatmul.msk.bf16.gmra.mxu1 %vm277_vm1, %v751_v39  ;;  %1445 = vmatmul.msk.bf16.gmra.mxu2 %vm277_vm1, %v875_v60  ;;  %v302_v63 = vpop.f32.mrf.mxu0 }
  0x9a   : > { %v1807_v0 = vpop.f32.mrf.mxu2  ;;  %1463 = vmatmul.msk.bf16.gmra.mxu3 %vm277_vm1, %v997_v62  ;;  %1480 = vmatmul.msk.bf16.gmra.mxu0 %vm277_vm1, %v1103_v25 }
  0x9c   : > { %v309_v1 = vpop.f32.mrf.mxu1 }
  0x9d   : > { %v1813_v2 = vpop.f32.mrf.mxu3 }
  0x9f   : > { %v304_v3 = vpop.f32.mrf.mxu0 }
  0xa2   : > { %v1818_v14 = vpop.f32.mrf.mxu2 }
  0xa4   : > { %v358_v18 = vpop.f32.mrf.mxu1 }
  0xa5   : > { %v359_v21 = vadd.f32 %v358_v18, %v302_v63  ;;  %v1823_v28 = vpop.f32.mrf.mxu3 }
  0xa7   : > { %1414 = vmatmul.msk.bf16.gmra.mxu1 %vm277_vm1, %v753_v19  ;;  %1446 = vmatmul.msk.bf16.gmra.mxu2 %vm277_vm1, %v877_v20  ;;  %v700_v22 = vpop.f32.mrf.mxu0 }
  0xaa   : > { %v317_v8 = vpop.f32.mrf.mxu2  ;;  %1464 = vmatmul.msk.bf16.gmra.mxu3 %vm277_vm1, %v1006_v41  ;;  %1481 = vmatmul.msk.bf16.gmra.mxu0 %vm277_vm1, %v1105_v23 }
  0xac   : > { %v360_v27 = vpop.f32.mrf.mxu1 }
  0xad   : > { %v361_v29 = vadd.f32 %v360_v27, %v304_v3  ;;  %v566_v31 = vpop.f32.mrf.mxu3 }
  0xaf   : > { %v702_v32 = vpop.f32.mrf.mxu0 }
  0xb2   : > { %v319_v37 = vpop.f32.mrf.mxu2 }
  0xb4   : > { %v363_v9 = vpop.f32.mrf.mxu1 }
  0xb5   : > { %v364_v44 = vadd.f32 %v363_v9, %v307_v59  ;;  %v568_v46 = vpop.f32.mrf.mxu3  ;;  %v880_v59 = vrot.slane %v870_v30, 2 }
  0xb7   : > { %1415 = vmatmul.msk.bf16.gmra.mxu1 %vm277_vm1, %v755_v42  ;;  %1447 = vmatmul.msk.bf16.gmra.mxu2 %vm277_vm1, %v879_v43  ;;  %v705_v61 = vpop.f32.mrf.mxu0  ;;  %v881_v63 = vsel %vm744_vm4, %v878_v36, %v880_v59 }
  0xba   : > { %v440_v51 = vpop.f32.mrf.mxu2  ;;  %1465 = vmatmul.msk.bf16.gmra.mxu3 %vm277_vm1, %v1015_v47  ;;  %1482 = vmatmul.msk.bf16.gmra.mxu0 %vm277_vm1, %v1107_v48 }
  0xbb   : > { %v465_v52 = vadd.f32 %v440_v51, %v359_v21 }
  0xbc   : > { %v365_v53 = vpop.f32.mrf.mxu1 }
  0xbd   : > { %v591_v54 = vadd.f32 %v566_v31, %v465_v52  ;;  %v366_v55 = vadd.f32 %v365_v53, %v309_v1  ;;  %v571_v56 = vpop.f32.mrf.mxu3 }
  0xbf   : > { %v707_v57 = vpop.f32.mrf.mxu0  ;;  %v1842_v58 = vadd.f32 %v700_v22, %v591_v54 }
  0xc2   : > { %v442_v39 = vpop.f32.mrf.mxu2 }
  0xc3   : > { %v466_v60 = vadd.f32 %v442_v39, %v361_v29 }
  0xc4   : > { %v368_v62 = vpop.f32.mrf.mxu1 }
  0xc5   : > { %v592_v25 = vadd.f32 %v568_v46, %v466_v60  ;;  %v369_v10 = vadd.f32 %v368_v62, %v1807_v0  ;;  %v573_v7 = vpop.f32.mrf.mxu3 }
  0xc7   : > { %1448 = vmatmul.msk.bf16.gmra.mxu2 %vm277_vm1, %v881_v63  ;;  %v710_v49 = vpop.f32.mrf.mxu0  ;;  %v1847_v3 = vadd.f32 %v702_v32, %v592_v25 }
  0xca   : > { %v445_v1 = vpop.f32.mrf.mxu2 }
  0xcb   : > { %v467_v4 = vadd.f32 %v445_v1, %v364_v44 }
  0xcc   : > { %v370_v5 = vpop.f32.mrf.mxu1 }
  0xcd   : > { %v593_v6 = vadd.f32 %v571_v56, %v467_v4  ;;  %v371_v12 = vadd.f32 %v370_v5, %v1818_v14  ;;  %v576_v13 = vpop.f32.mrf.mxu3  ;;  %v1872_v5 = vld [vmem:[%s1924_s2] ss:$0 sm:$0xff] }
  0xcf   : > { %v712_v15 = vpop.f32.mrf.mxu0  ;;  %v1850_v16 = vadd.f32 %v705_v61, %v593_v6 }
  0xd2   : > { %v447_v17 = vpop.f32.mrf.mxu2 }
  0xd3   : > { %v468_v18 = vadd.f32 %v447_v17, %v366_v55 }
  0xd4   : > { %v373_v19 = vpop.f32.mrf.mxu1 }
  0xd5   : > { %v594_v0 = vadd.f32 %v573_v7, %v468_v18  ;;  %v374_v20 = vadd.f32 %v373_v19, %v317_v8  ;;  %v578_v21 = vpop.f32.mrf.mxu3 }
  0xd7   : > { %v715_v41 = vpop.f32.mrf.mxu0  ;;  %v1852_v22 = vadd.f32 %v707_v57, %v594_v0 }
  0xda   : > { %v450_v23 = vpop.f32.mrf.mxu2 }
  0xdb   : > { %v469_v24 = vadd.f32 %v450_v23, %v369_v10 }
  0xdc   : > { %v375_v11 = vpop.f32.mrf.mxu1 }
  0xdd   : > { %v595_v26 = vadd.f32 %v576_v13, %v469_v24  ;;  %v376_v27 = vadd.f32 %v375_v11, %v319_v37  ;;  %v581_v29 = vpop.f32.mrf.mxu3 }
  0xdf   : > { %v717_v14 = vpop.f32.mrf.mxu0  ;;  %v1854_v31 = vadd.f32 %v710_v49, %v595_v26 }
  0xe2   : > { %v452_v32 = vpop.f32.mrf.mxu2 }
  0xe3   : > { %v470_v33 = vadd.f32 %v452_v32, %v371_v12 }
  0xe4   : > { %v378_v34 = vpop.f32.mrf.mxu1 }
  0xe5   : > { %v596_v35 = vadd.f32 %v578_v21, %v470_v33  ;;  %v379_v36 = vadd.f32 %v378_v34, %v1813_v2  ;;  %v583_v8 = vpop.f32.mrf.mxu3 }
  0xe7   : > { %v1857_v38 = vadd.f32 %v712_v15, %v596_v35  ;;  %v720_v40 = vpop.f32.mrf.mxu0 }
  0xea   : > { %v455_v9 = vpop.f32.mrf.mxu2 }
  0xeb   : > { %v471_v42 = vadd.f32 %v455_v9, %v374_v20 }
  0xec   : > { %v380_v43 = vpop.f32.mrf.mxu1 }
  0xed   : > { %v597_v44 = vadd.f32 %v581_v29, %v471_v42  ;;  %v381_v37 = vadd.f32 %v380_v43, %v1823_v28  ;;  %v586_v46 = vpop.f32.mrf.mxu3 }
  0xef   : > { %v1860_v45 = vadd.f32 %v715_v41, %v597_v44  ;;  %v722_v61 = vpop.f32.mrf.mxu0 }
  0xf2   : > { %v457_v47 = vpop.f32.mrf.mxu2 }
  0xf3   : > { %v472_v48 = vadd.f32 %v457_v47, %v376_v27 }
  0xf4   : > { %v792_v50 = vpop.f32.mrf.mxu1 }
  0xf5   : > { %v598_v51 = vadd.f32 %v583_v8, %v472_v48  ;;  %v588_v52 = vpop.f32.mrf.mxu3  ;;  %v817_v7 = vadd.f32 %v792_v50, %v1842_v58 }
  0xf7   : > { %v1862_v2 = vadd.f32 %v717_v14, %v598_v51  ;;  %v1144_v54 = vpop.f32.mrf.mxu0 }
  0xfa   : > { %v460_v53 = vpop.f32.mrf.mxu2 }
  0xfb   : > { %v473_v30 = vadd.f32 %v460_v53, %v379_v36 }
  0xfc   : > { %v794_v57 = vpop.f32.mrf.mxu1 }
  0xfd   : > { %v599_v55 = vadd.f32 %v586_v46, %v473_v30  ;;  %v1052_v56 = vpop.f32.mrf.mxu3  ;;  %v818_v15 = vadd.f32 %v794_v57, %v1847_v3 }
  0xff   : > { %v1864_v59 = vadd.f32 %v720_v40, %v599_v55  ;;  %v1146_v63 = vpop.f32.mrf.mxu0 }
 0x102   : > { %v462_v28 = vpop.f32.mrf.mxu2 }
 0x103   : > { %v474_v39 = vadd.f32 %v462_v28, %v381_v37 }
 0x104   : > { %v797_v10 = vpop.f32.mrf.mxu1 }
 0x105   : > { %v600_v60 = vadd.f32 %v588_v52, %v474_v39  ;;  %v1054_v62 = vpop.f32.mrf.mxu3  ;;  %v819_v23 = vadd.f32 %v797_v10, %v1850_v16 }
 0x107   : > { %v1866_v25 = vadd.f32 %v722_v61, %v600_v60  ;;  %v1149_v13 = vpop.f32.mrf.mxu0 }
 0x10a   : > { %v918_v49 = vpop.f32.mrf.mxu2 }
 0x10b   : > { %v943_v1 = vadd.f32 %v918_v49, %v817_v7 }
 0x10c   : > { %v799_v18 = vpop.f32.mrf.mxu1 }
 0x10d   : > { %v1077_v4 = vadd.f32 %v1052_v56, %v943_v1  ;;  %v1057_v6 = vpop.f32.mrf.mxu3  ;;  %v820_v35 = vadd.f32 %v799_v18, %v1852_v22 }
 0x10f   : > { %v1169_v12 = vadd.f32 %v1144_v54, %v1077_v4  ;;  %v1151_v26 = vpop.f32.mrf.mxu0 }
 0x111   : > { %v1183_v17 = vadd.f32 %v1872_v5, %v1169_v12 }
 0x112   : > { %v920_v19 = vpop.f32.mrf.mxu2 }
 0x113   : > { %v1193_v0 = vmax.f32 %v1183_v17, 0.0  ;;  %v944_v58 = vadd.f32 %v920_v19, %v818_v15 }
 0x114   : > { %v802_v14 = vpop.f32.mrf.mxu1 }
 0x115   : > { %v1203_v20 = vpack.c.bf16 %v1193_v0, %v1193_v0  ;;  %v1078_v21 = vadd.f32 %v1054_v62, %v944_v58  ;;  %v1059_v3 = vpop.f32.mrf.mxu3  ;;  %v821_v47 = vadd.f32 %v802_v14, %v1854_v31 }
 0x117   : > { %1214 = vst.msk [vmem:[%s1880_s7] sm:$0xf] %vm1213_vm7, %v1203_v20  ;;  %v1170_v41 = vadd.f32 %v1146_v63, %v1078_v21  ;;  %v1154_v42 = vpop.f32.mrf.mxu0 }
 0x119   : > { %v1184_v24 = vadd.f32 %v1872_v5, %v1170_v41 }
 0x11a   : > { %v923_v11 = vpop.f32.mrf.mxu2 }
 0x11b   : > { %v1194_v27 = vmax.f32 %v1184_v24, 0.0  ;;  %v945_v29 = vadd.f32 %v923_v11, %v819_v23 }
 0x11c   : > { %v804_v37 = vpop.f32.mrf.mxu1 }
 0x11d   : > { %v1204_v32 = vpack.c.bf16 %v1194_v27, %v1194_v27  ;;  %v1079_v33 = vadd.f32 %v1057_v6, %v945_v29  ;;  %v1062_v40 = vpop.f32.mrf.mxu3  ;;  %v822_v56 = vadd.f32 %v804_v37, %v1857_v38 }
 0x11f   : > { %1215 = vst.msk [vmem:[%s1880_s7 + $0x4] sm:$0xf] %vm1213_vm7, %v1204_v32  ;;  %v1171_v34 = vadd.f32 %v1149_v13, %v1079_v33  ;;  %v1156_v30 = vpop.f32.mrf.mxu0 }
 0x121   : > { %v1185_v36 = vadd.f32 %v1872_v5, %v1171_v34 }
 0x122   : > { %v925_v8 = vpop.f32.mrf.mxu2 }
 0x123   : > { %v1195_v16 = vmax.f32 %v1185_v36, 0.0  ;;  %v946_v9 = vadd.f32 %v925_v8, %v820_v35 }
 0x124   : > { %v807_v55 = vpop.f32.mrf.mxu1 }
 0x125   : > { %v1205_v43 = vpack.c.bf16 %v1195_v16, %v1195_v16  ;;  %v1080_v44 = vadd.f32 %v1059_v3, %v946_v9  ;;  %v1064_v51 = vpop.f32.mrf.mxu3  ;;  %v823_v49 = vadd.f32 %v807_v55, %v1860_v45 }
 0x127   : > { %1216 = vst.msk [vmem:[%s1880_s7 + $0x8] sm:$0xf] %vm1213_vm7, %v1205_v43  ;;  %v1172_v46 = vadd.f32 %v1151_v26, %v1080_v44  ;;  %v1159_v7 = vpop.f32.mrf.mxu0 }
 0x129   : > { %v1186_v61 = vadd.f32 %v1872_v5, %v1172_v46 }
 0x12a   : > { %v928_v48 = vpop.f32.mrf.mxu2 }
 0x12b   : > { %v1196_v22 = vmax.f32 %v1186_v61, 0.0  ;;  %v947_v50 = vadd.f32 %v928_v48, %v821_v47 }
 0x12c   : > { %v809_v4 = vpop.f32.mrf.mxu1 }
 0x12d   : > { %v1206_v52 = vpack.c.bf16 %v1196_v22, %v1196_v22  ;;  %v1081_v53 = vadd.f32 %v1062_v40, %v947_v50  ;;  %v1067_v63 = vpop.f32.mrf.mxu3  ;;  %v824_v19 = vadd.f32 %v809_v4, %v1862_v2 }
 0x12f   : > { %1217 = vst.msk [vmem:[%s1880_s7 + $0xc] sm:$0xf] %vm1213_vm7, %v1206_v52  ;;  %v1173_v54 = vadd.f32 %v1154_v42, %v1081_v53  ;;  %v1161_v58 = vpop.f32.mrf.mxu0 }
 0x131   : > { %v1187_v57 = vadd.f32 %v1872_v5, %v1173_v54 }
 0x132   : > { %v930_v28 = vpop.f32.mrf.mxu2 }
 0x133   : > { %v1197_v31 = vmax.f32 %v1187_v57, 0.0  ;;  %v948_v39 = vadd.f32 %v930_v28, %v822_v56 }
 0x134   : > { %v812_v41 = vpop.f32.mrf.mxu1 }
 0x135   : > { %v1207_v60 = vpack.c.bf16 %v1197_v31, %v1197_v31  ;;  %v1082_v62 = vadd.f32 %v1064_v51, %v948_v39  ;;  %v1069_v18 = vpop.f32.mrf.mxu3  ;;  %v825_v11 = vadd.f32 %v812_v41, %v1864_v59 }
 0x137   : > { %1218 = vst.msk [vmem:[%s1880_s7 + $0x10] sm:$0xf] %vm1213_vm7, %v1207_v60  ;;  %v1174_v10 = vadd.f32 %v1156_v30, %v1082_v62  ;;  %v1164_v32 = vpop.f32.mrf.mxu0 }
 0x139   : > { %v1188_v1 = vadd.f32 %v1872_v5, %v1174_v10 }
 0x13a   : > { %v933_v6 = vpop.f32.mrf.mxu2 }
 0x13b   : > { %v1198_v38 = vmax.f32 %v1188_v1, 0.0  ;;  %v949_v12 = vadd.f32 %v933_v6, %v823_v49 }
 0x13c   : > { %v814_v35 = vpop.f32.mrf.mxu1 }
 0x13d   : > { %v1208_v13 = vpack.c.bf16 %v1198_v38, %v1198_v38  ;;  %v1083_v15 = vadd.f32 %v1067_v63, %v949_v12  ;;  %v1072_v27 = vpop.f32.mrf.mxu3  ;;  %v826_v8 = vadd.f32 %v814_v35, %v1866_v25 }
 0x13f   : > { %1219 = vst.msk [vmem:[%s1880_s7 + $0x14] sm:$0xf] %vm1213_vm7, %v1208_v13  ;;  %v1175_v17 = vadd.f32 %v1159_v7, %v1083_v15  ;;  %v1166_v37 = vpop.f32.mrf.mxu0 }
 0x141   : > { %v1189_v0 = vadd.f32 %v1872_v5, %v1175_v17 }
 0x142   : > { %v935_v20 = vpop.f32.mrf.mxu2 }
 0x143   : > { %v1199_v45 = vmax.f32 %v1189_v0, 0.0  ;;  %v950_v21 = vadd.f32 %v935_v20, %v824_v19 }
 0x145   : > { %v1209_v3 = vpack.c.bf16 %v1199_v45, %v1199_v45  ;;  %v1084_v23 = vadd.f32 %v1069_v18, %v950_v21  ;;  %v1074_v42 = vpop.f32.mrf.mxu3 }
 0x147   : > { %1220 = vst.msk [vmem:[%s1880_s7 + $0x18] sm:$0xf] %vm1213_vm7, %v1209_v3  ;;  %v1176_v24 = vadd.f32 %v1161_v58, %v1084_v23 }
 0x149   : > { %v1190_v26 = vadd.f32 %v1872_v5, %v1176_v24 }
 0x14a   : > { %v938_v29 = vpop.f32.mrf.mxu2 }
 0x14b   : > { %v1200_v2 = vmax.f32 %v1190_v26, 0.0  ;;  %v951_v14 = vadd.f32 %v938_v29, %v825_v11 }
 0x14d   : > { %v1210_v33 = vpack.c.bf16 %v1200_v2, %v1200_v2  ;;  %v1085_v34 = vadd.f32 %v1072_v27, %v951_v14 }
 0x14f   : > { %1221 = vst.msk [vmem:[%s1880_s7 + $0x1c] sm:$0xf] %vm1213_vm7, %v1210_v33  ;;  %v1177_v36 = vadd.f32 %v1164_v32, %v1085_v34 }
 0x151   : > { %v1191_v40 = vadd.f32 %v1872_v5, %v1177_v36 }
 0x152   : > { %v940_v59 = vpop.f32.mrf.mxu2 }
 0x153   : > { %v1201_v16 = vmax.f32 %v1191_v40, 0.0  ;;  %v952_v9 = vadd.f32 %v940_v59, %v826_v8 }
 0x155   : > { %v1211_v43 = vpack.c.bf16 %v1201_v16, %v1201_v16  ;;  %v1086_v44 = vadd.f32 %v1074_v42, %v952_v9 }
 0x157   : > { %1222 = vst.msk [vmem:[%s1880_s7 + $0x20] sm:$0xf] %vm1213_vm7, %v1211_v43  ;;  %v1178_v46 = vadd.f32 %v1166_v37, %v1086_v44 }
 0x159   : > { %v1192_v47 = vadd.f32 %v1872_v5, %v1178_v46 }
 0x15b   : > { %v1202_v61 = vmax.f32 %v1192_v47, 0.0 }
 0x15d   : > { %v1212_v48 = vpack.c.bf16 %v1202_v61, %v1202_v61 }
 0x15f   : > { %1223 = vst.msk [vmem:[%s1880_s7 + $0x24] sm:$0xf] %vm1213_vm7, %v1212_v48 }
 0x160 PF: > { %s13_s12 = sadd.s32 1, %s1545_s12  }
 0x161   : > { %p10_p4 = scmp.ge.s32.totalorder %s13_s12, 4  }
 0x163   :  { %12 = sbr.rel (!%p10_p4) target bundleno = 1 (0x1), region = 70 }

// kernel: forward.7
= control target key start
LH: loop header
LB: loop body
LE: loop exit
PB: predicated region body
PF: predicated region fallthrough
CT: control target
= control target key end

     0   :  { %s483_s0 = inlined_call_operand.vmem [shape: bf16[128,32], index: 0, kind: input, shape index: {}]   ;;  %s484_s1 = inlined_call_operand.vmem [shape: bf16[32,128], index: 1, kind: input, shape index: {}]   ;;  %s485_s2 = inlined_call_operand.vmem [shape: f32[1,128], index: 2, kind: input, shape index: {}]   ;;  %s486_s3 = inlined_call_operand.vmem [shape: f32[128,128], index: 3, kind: input, shape index: {}]   ;;  %s487_s4 = inlined_call_operand.hbm [shape: f32[128,128], index: 4, kind: output, shape index: {}]  }
   0x1   :  { %v308_v0 = vld [vmem:[%s484_s1 + $0x8] sm:$0xff]  ;;  %v307_v1 = vld [vmem:[%s484_s1] sm:$0xff] }
   0x2   :  { %126 = vmatpush.bf16.msra.mxu0 %v308_v0  ;;  %309 = vmatpush.bf16.msra.mxu1 %v308_v0 }
   0x3   :  { %310 = vmatpush.bf16.msra.mxu2 %v308_v0  ;;  %311 = vmatpush.bf16.msra.mxu3 %v308_v0 }
   0x4   :  { %9 = vsyncpa [#allocation3], 0  ;;  %v299_v2 = vld [vmem:[%s483_s0] sm:$0xff]  ;;  %v301_v3 = vld [vmem:[%s483_s0 + $0x10] sm:$0xff]  ;;  %vm95_vm0 = vcmask 261120   ;;  %s345_s12 = smov [#allocation2]  }
   0x5   :  { %v303_v4 = vld [vmem:[%s483_s0 + $0x20] sm:$0xff]  ;;  %v305_v5 = vld [vmem:[%s483_s0 + $0x30] sm:$0xff]  ;;  %v300_v6 = vld [vmem:[%s483_s0 + $0x8] sm:$0xff]  ;;  %s239_s15 = sshll.u32 %s487_s4, 4  ;;  %s347_s16 = smov 8   ;;  %s240_s15 = int_to_ptr.hbm [resolvable:$true] %s239_s15 }
   0x6   :  { %127 = vmatpush.bf16.msra.mxu0 %v307_v1  ;;  %312 = vmatpush.bf16.msra.mxu1 %v307_v1  ;;  %v302_v7 = vld [vmem:[%s483_s0 + $0x18] sm:$0xff]  ;;  %v304_v8 = vld [vmem:[%s483_s0 + $0x28] sm:$0xff]  ;;  %v414_v10 = vld [vmem:[%s485_s2] ss:$0 sm:$0xff]  ;;  %s237_s2 = sshll.u32 %s345_s12, 4  ;;  %s238_s2 = int_to_ptr.vmem [resolvable:$true] %s237_s2 }
   0x7   :  { %313 = vmatpush.bf16.msra.mxu2 %v307_v1  ;;  %314 = vmatpush.bf16.msra.mxu3 %v307_v1  ;;  %v306_v9 = vld [vmem:[%s483_s0 + $0x38] sm:$0xff]  ;;  %v169_v12 = vld [vmem:[%s486_s3] sm:$0xff]  ;;  %v170_v28 = vld [vmem:[%s486_s3 + $0x8] sm:$0xff] }
   0x8   :  { %v173_v14 = vld [vmem:[%s486_s3 + $0x20] sm:$0xff]  ;;  %v174_v30 = vld [vmem:[%s486_s3 + $0x28] sm:$0xff]  ;;  %v171_v48 = vld [vmem:[%s486_s3 + $0x10] sm:$0xff] }
   0x9   :  { %291 = vmatmul.msk.bf16.vlgmr.msra.gmra.mxu0 %vm95_vm0, %v299_v2  ;;  %293 = vmatmul.msk.bf16.vlgmr.msra.gmra.mxu1 %vm95_vm0, %v301_v3  ;;  %v177_v22 = vld [vmem:[%s486_s3 + $0x40] sm:$0xff]  ;;  %v178_v42 = vld [vmem:[%s486_s3 + $0x48] sm:$0xff]  ;;  %v175_v50 = vld [vmem:[%s486_s3 + $0x30] sm:$0xff] }
   0xa   :  { %295 = vmatmul.msk.bf16.vlgmr.msra.gmra.mxu2 %vm95_vm0, %v303_v4  ;;  %297 = vmatmul.msk.bf16.vlgmr.msra.gmra.mxu3 %vm95_vm0, %v305_v5  ;;  %v181_v24 = vld [vmem:[%s486_s3 + $0x60] sm:$0xff]  ;;  %v182_v44 = vld [vmem:[%s486_s3 + $0x68] sm:$0xff]  ;;  %v179_v62 = vld [vmem:[%s486_s3 + $0x50] sm:$0xff] }
   0xb   :  { %v183_v0 = vld [vmem:[%s486_s3 + $0x70] sm:$0xff]  ;;  %v172_v4 = vld [vmem:[%s486_s3 + $0x18] sm:$0xff] }
  0x19   :  { %292 = vmatmul.msk.bf16.gmra.mxu0 %vm95_vm0, %v300_v6  ;;  %294 = vmatmul.msk.bf16.gmra.mxu1 %vm95_vm0, %v302_v7  ;;  %v176_v6 = vld [vmem:[%s486_s3 + $0x38] sm:$0xff] }
  0x1a   :  { %296 = vmatmul.msk.bf16.gmra.mxu2 %vm95_vm0, %v304_v8  ;;  %298 = vmatmul.msk.bf16.gmra.mxu3 %vm95_vm0, %v306_v9 }
  0x86   :  { %v129_v11 = vpop.f32.mrf.mxu0  ;;  %v139_v13 = vpop.f32.mrf.mxu1 }
  0x87   :  { %v130_v15 = vadd.f32 %v414_v10, %v129_v11  ;;  %v140_v16 = vadd.f32 %v414_v10, %v139_v13 }
  0x89   :  { %v185_v17 = vadd.f32 %v169_v12, %v130_v15  ;;  %v189_v18 = vadd.f32 %v173_v14, %v140_v16 }
  0x8b   :  { %v201_v19 = vmax.f32 %v185_v17, 0.0  ;;  %v205_v20 = vmax.f32 %v189_v18, 0.0 }
  0x8d   :  { %217 = vst [vmem:[#allocation2] sm:$0xff] %v201_v19  ;;  %v149_v21 = vpop.f32.mrf.mxu2  ;;  %v159_v23 = vpop.f32.mrf.mxu3  ;;  %v180_v19 = vld [vmem:[%s486_s3 + $0x58] sm:$0xff] }
  0x8e   :  { %221 = vst [vmem:[#allocation2 + $0x20] sm:$0xff] %v205_v20  ;;  %v150_v25 = vadd.f32 %v414_v10, %v149_v21  ;;  %v160_v26 = vadd.f32 %v414_v10, %v159_v23  ;;  %v131_v27 = vpop.f32.mrf.mxu0  ;;  %v141_v29 = vpop.f32.mrf.mxu1  ;;  %v184_v21 = vld [vmem:[%s486_s3 + $0x78] sm:$0xff]  ;;  %s346_s3 = smov 128  }
  0x8f   :  { %v132_v31 = vadd.f32 %v414_v10, %v131_v27  ;;  %v142_v32 = vadd.f32 %v414_v10, %v141_v29 }
  0x90   :  { %v193_v33 = vadd.f32 %v177_v22, %v150_v25  ;;  %v197_v34 = vadd.f32 %v181_v24, %v160_v26 }
  0x91   :  { %v186_v35 = vadd.f32 %v170_v28, %v132_v31  ;;  %v190_v36 = vadd.f32 %v174_v30, %v142_v32 }
  0x92   :  { %v209_v37 = vmax.f32 %v193_v33, 0.0  ;;  %v213_v38 = vmax.f32 %v197_v34, 0.0 }
  0x93   :  { %v202_v39 = vmax.f32 %v186_v35, 0.0  ;;  %v206_v40 = vmax.f32 %v190_v36, 0.0 }
  0x94   :  { %225 = vst [vmem:[#allocation2 + $0x40] sm:$0xff] %v209_v37 }
  0x95   :  { %229 = vst [vmem:[#allocation2 + $0x60] sm:$0xff] %v213_v38  ;;  %v151_v41 = vpop.f32.mrf.mxu2  ;;  %v161_v43 = vpop.f32.mrf.mxu3 }
  0x96   :  { %218 = vst [vmem:[#allocation2 + $0x8] sm:$0xff] %v202_v39  ;;  %v152_v45 = vadd.f32 %v414_v10, %v151_v41  ;;  %v162_v46 = vadd.f32 %v414_v10, %v161_v43  ;;  %v134_v47 = vpop.f32.mrf.mxu0  ;;  %v144_v49 = vpop.f32.mrf.mxu1 }
  0x97   :  { %222 = vst [vmem:[#allocation2 + $0x28] sm:$0xff] %v206_v40  ;;  %v135_v51 = vadd.f32 %v414_v10, %v134_v47  ;;  %v145_v52 = vadd.f32 %v414_v10, %v144_v49 }
  0x98   :  { %v194_v53 = vadd.f32 %v178_v42, %v152_v45  ;;  %v198_v54 = vadd.f32 %v182_v44, %v162_v46 }
  0x99   :  { %v187_v55 = vadd.f32 %v171_v48, %v135_v51  ;;  %v191_v56 = vadd.f32 %v175_v50, %v145_v52 }
  0x9a   :  { %v210_v57 = vmax.f32 %v194_v53, 0.0  ;;  %v214_v58 = vmax.f32 %v198_v54, 0.0 }
  0x9b   :  { %v203_v59 = vmax.f32 %v187_v55, 0.0  ;;  %v207_v60 = vmax.f32 %v191_v56, 0.0 }
  0x9c   :  { %226 = vst [vmem:[#allocation2 + $0x48] sm:$0xff] %v210_v57 }
  0x9d   :  { %230 = vst [vmem:[#allocation2 + $0x68] sm:$0xff] %v214_v58  ;;  %v154_v61 = vpop.f32.mrf.mxu2  ;;  %v164_v63 = vpop.f32.mrf.mxu3 }
  0x9e   :  { %219 = vst [vmem:[#allocation2 + $0x10] sm:$0xff] %v203_v59  ;;  %v155_v1 = vadd.f32 %v414_v10, %v154_v61  ;;  %v165_v2 = vadd.f32 %v414_v10, %v164_v63  ;;  %v136_v3 = vpop.f32.mrf.mxu0  ;;  %v146_v5 = vpop.f32.mrf.mxu1 }
  0x9f   :  { %223 = vst [vmem:[#allocation2 + $0x30] sm:$0xff] %v207_v60  ;;  %v137_v7 = vadd.f32 %v414_v10, %v136_v3  ;;  %v147_v8 = vadd.f32 %v414_v10, %v146_v5 }
  0xa0   :  { %v195_v9 = vadd.f32 %v179_v62, %v155_v1  ;;  %v199_v11 = vadd.f32 %v183_v0, %v165_v2 }
  0xa1   :  { %v188_v12 = vadd.f32 %v172_v4, %v137_v7  ;;  %v192_v13 = vadd.f32 %v176_v6, %v147_v8 }
  0xa2   :  { %v211_v14 = vmax.f32 %v195_v9, 0.0  ;;  %v215_v15 = vmax.f32 %v199_v11, 0.0 }
  0xa3   :  { %v204_v16 = vmax.f32 %v188_v12, 0.0  ;;  %v208_v17 = vmax.f32 %v192_v13, 0.0 }
  0xa4   :  { %227 = vst [vmem:[#allocation2 + $0x50] sm:$0xff] %v211_v14 }
  0xa5   :  { %231 = vst [vmem:[#allocation2 + $0x70] sm:$0xff] %v215_v15  ;;  %v156_v18 = vpop.f32.mrf.mxu2  ;;  %v166_v20 = vpop.f32.mrf.mxu3 }
  0xa6   :  { %220 = vst [vmem:[#allocation2 + $0x18] sm:$0xff] %v204_v16  ;;  %v157_v22 = vadd.f32 %v414_v10, %v156_v18  ;;  %v167_v23 = vadd.f32 %v414_v10, %v166_v20 }
  0xa7   :  { %224 = vst [vmem:[#allocation2 + $0x38] sm:$0xff] %v208_v17 }
  0xa8   :  { %v196_v24 = vadd.f32 %v180_v19, %v157_v22  ;;  %v200_v25 = vadd.f32 %v184_v21, %v167_v23 }
  0xaa   :  { %v212_v26 = vmax.f32 %v196_v24, 0.0  ;;  %v216_v27 = vmax.f32 %v200_v25, 0.0 }
  0xac   :  { %228 = vst [vmem:[#allocation2 + $0x58] sm:$0xff] %v212_v26 }
  0xad   :  { %232 = vst [vmem:[#allocation2 + $0x78] sm:$0xff] %v216_v27 }
  0xae   :  { %245 = dma.vmem_to_hbm [thread:$0]  %s238_s2, 2048, %s240_s15, [#allocation3], %s346_s3, %s346_s3, %s347_s16  }
  0xaf   :  { %343 = dma.done.wait [#allocation3], 2048  }
  0xb0   :  { %344 = vsyncadd [#allocation3], 4294965248 }
  0xb1   :  { %250 = vsyncpa [#allocation3], 1 }

</bundles_post_ra>
